<compile_context>
chip_gen: v7x
topology: tpu7x:2x2x1
jax: 0.10.0
libtpu: 0.0.40
codegen_flags: <defaults>
</compile_context>

<pallas_src>
import functools

import jax
import jax.numpy as jnp
from jax.experimental import pallas as pl
from jax.experimental.pallas import tpu as pltpu

# ----------------------- small synthetic BERT config -----------------------
VOCAB = 100
TYPE_VOCAB = 2
MAX_POS = 16
HIDDEN = 32
N_HEADS = 2
HEAD_DIM = HIDDEN // N_HEADS
INTERMEDIATE = 64
N_LAYERS = 2
LN_EPS = 1e-12
LANE = 128
# args.pooling == 'mean' (SimKGC default): masked mean over sequence + L2 norm
POOLING = "mean"


# ------------------------------ fused encoder kernel ------------------------------
def _gelu(x):
    # TODO(synk): HF BertIntermediate 'gelu' is the exact erf GELU; tanh approx
    # differs at ~1e-3 level (kept for a rock-solid Mosaic lowering).
    return 0.5 * x * (1.0 + jnp.tanh(
        0.7978845608028654 * (x + 0.044715 * x * x * x)))


def _encoder_kernel(emb_ref, bias_ref, pool_ref, wqkv_ref, wo_ref, w1_ref,
                    w2_ref, vec_ref, out_ref, *, Bp, S, H, NH, DH, I, L, eps):
    """Full BERT encoder + masked-mean pool + L2 normalize for one weight set.

    One grid point == one (weight set, batch group); everything stays in
    VMEM/vregs end-to-end (layer loop unrolled in Python).
    """
    f32 = jnp.float32
    R = Bp * S          # rows of the residual stream
    scale = 1.0 / (DH ** 0.5)

    vec = vec_ref[0]                       # [2 + 13L, 128] packed small vectors
    attn_bias = bias_ref[0]                # [NH*R, NH*R] block-diag + key mask
    poolm = pool_ref[0]                    # [Bp, R] mask/denominator matrix

    def ln(x, g_row, b_row):
        mu = jnp.mean(x, axis=-1, keepdims=True)
        xc = x - mu
        var = jnp.mean(xc * xc, axis=-1, keepdims=True)
        return xc * jax.lax.rsqrt(var + eps) * g_row[:, :H] + b_row[:, :H]

    # embedding LayerNorm
    h = ln(emb_ref[...].astype(f32), vec[0:1], vec[1:2])          # [R, H]

    for l in range(L):                                            # unrolled
        base = 2 + 13 * l

        # fused QKV projection; per-(head, q/k/v) 128-lane slots -> all lane
        # slices below are 128-aligned full-vreg views.
        qkv = jnp.dot(h, wqkv_ref[l], preferred_element_type=f32)  # [R, 3*NH*128]

        stacks = []
        for kind in range(3):                                      # 0:q 1:k 2:v
            rows = []
            for hd in range(NH):
                slot = 3 * hd + kind
                rows.append(qkv[:, slot * LANE:(slot + 1) * LANE]
                            + vec[base + slot:base + slot + 1])
            stacks.append(jnp.concatenate(rows, axis=0))           # [NH*R, 128]
        q_stack, k_stack, v_stack = stacks

        # one block-diagonal scores matmul for all (batch, head) blocks
        s = jax.lax.dot_general(q_stack, k_stack, (((1,), (1,)), ((), ())),
                                preferred_element_type=f32) * scale + attn_bias
        m = jnp.max(s, axis=-1, keepdims=True)
        p = jnp.exp(s - m)
        p = p / jnp.sum(p, axis=-1, keepdims=True)                 # exact divide
        ctx = jnp.dot(p, v_stack, preferred_element_type=f32)      # [NH*R, 128]

        # heads back onto lanes, single dot against the padded Wo
        ctx_cat = jnp.concatenate(
            [ctx[hd * R:(hd + 1) * R, :] for hd in range(NH)], axis=1)  # [R, NH*128]
        attn = jnp.dot(ctx_cat, wo_ref[l],
                       preferred_element_type=f32) + vec[base + 6:base + 7, :H]
        h = ln(h + attn, vec[base + 9:base + 10], vec[base + 10:base + 11])

        ff = jnp.dot(h, w1_ref[l], preferred_element_type=f32) + vec[base + 7:base + 8, :I]
        ff = _gelu(ff)
        ff = jnp.dot(ff, w2_ref[l], preferred_element_type=f32) + vec[base + 8:base + 9, :H]
        h = ln(h + ff, vec[base + 11:base + 12], vec[base + 12:base + 13])

    # ----- masked-mean pooling (single matmul) + F.normalize(dim=1) -----
    pooled = jnp.dot(poolm, h, preferred_element_type=f32)         # [Bp, H]
    nrm2 = jnp.sum(pooled * pooled, axis=-1, keepdims=True)
    normed = pooled * jax.lax.rsqrt(jnp.maximum(nrm2, 1e-24))      # x / max(||x||,1e-12)
    out = jnp.concatenate([normed, jnp.zeros((Bp, LANE - H), f32)], axis=1)
    out_ref[0] = out.astype(out_ref.dtype)                         # lane-dense store


# --------------------------- parameters & packing ---------------------------
def init_bert_params(key):
    def nrm(k, shape, scale=0.02):
        return scale * jax.random.normal(k, shape, dtype=jnp.float32)

    keys = jax.random.split(key, 4 + N_LAYERS)
    params = {
        "word_emb": nrm(keys[0], (VOCAB, HIDDEN)),
        "pos_emb": nrm(keys[1], (MAX_POS, HIDDEN)),
        "type_emb": nrm(keys[2], (TYPE_VOCAB, HIDDEN)),
        "emb_ln_g": jnp.ones((HIDDEN,), jnp.float32),
        "emb_ln_b": jnp.zeros((HIDDEN,), jnp.float32),
        "layers": [],
    }
    for l in range(N_LAYERS):
        lk = jax.random.split(keys[4 + l], 6)
        params["layers"].append({
            "wq": nrm(lk[0], (HIDDEN, HIDDEN)), "bq": jnp.zeros((HIDDEN,), jnp.float32),
            "wk": nrm(lk[1], (HIDDEN, HIDDEN)), "bk": jnp.zeros((HIDDEN,), jnp.float32),
            "wv": nrm(lk[2], (HIDDEN, HIDDEN)), "bv": jnp.zeros((HIDDEN,), jnp.float32),
            "wo": nrm(lk[3], (HIDDEN, HIDDEN)), "bo": jnp.zeros((HIDDEN,), jnp.float32),
            "attn_ln_g": jnp.ones((HIDDEN,), jnp.float32),
            "attn_ln_b": jnp.zeros((HIDDEN,), jnp.float32),
            "w1": nrm(lk[4], (HIDDEN, INTERMEDIATE)),
            "b1": jnp.zeros((INTERMEDIATE,), jnp.float32),
            "w2": nrm(lk[5], (INTERMEDIATE, HIDDEN)),
            "b2": jnp.zeros((HIDDEN,), jnp.float32),
            "ffn_ln_g": jnp.ones((HIDDEN,), jnp.float32),
            "ffn_ln_b": jnp.zeros((HIDDEN,), jnp.float32),
        })
    return params


def _pack_encoder_params(params):
    """Pad/pack one encoder's weights into the kernel layout (init-time, one-off)."""
    H, I, NH, DH, L = HIDDEN, INTERMEDIATE, N_HEADS, HEAD_DIM, N_LAYERS

    def row(v):
        v = v.reshape(1, -1)
        return jnp.pad(v, ((0, 0), (0, LANE - v.shape[1])))

    wqkv = jnp.zeros((L, H, 3 * NH * LANE), jnp.float32)   # per-(head,kind) 128-lane slots
    wo = jnp.zeros((L, NH * LANE, H), jnp.float32)         # per-head 128-sublane slots
    w1 = jnp.stack([lp["w1"] for lp in params["layers"]])  # [L, H, I]
    w2 = jnp.stack([lp["w2"] for lp in params["layers"]])  # [L, I, H]

    rows = [row(params["emb_ln_g"]), row(params["emb_ln_b"])]
    for l, lp in enumerate(params["layers"]):
        for hd in range(NH):
            for kind, (w, b) in enumerate(((lp["wq"], lp["bq"]),
                                           (lp["wk"], lp["bk"]),
                                           (lp["wv"], lp["bv"]))):
                slot = 3 * hd + kind
                wqkv = wqkv.at[l, :, slot * LANE:slot * LANE + DH].set(
                    w[:, hd * DH:(hd + 1) * DH])
                rows.append(row(b[hd * DH:(hd + 1) * DH]))
            wo = wo.at[l, hd * LANE:hd * LANE + DH, :].set(
                lp["wo"][hd * DH:(hd + 1) * DH, :])
        rows += [row(lp["bo"]), row(lp["b1"]), row(lp["b2"]),
                 row(lp["attn_ln_g"]), row(lp["attn_ln_b"]),
                 row(lp["ffn_ln_g"]), row(lp["ffn_ln_b"])]
    slab = jnp.concatenate(rows, axis=0)                   # [2 + 13L, 128]

    return dict(wqkv=wqkv, wo=wo, w1=w1, w2=w2, slab=slab,
                word_emb=params["word_emb"], pos_emb=params["pos_emb"],
                type_emb=params["type_emb"])


def pack_model_params(hr_params, tail_params):
    """Init-time packing of both encoders (group 0 = hr_bert, group 1 = tail_bert)."""
    a, b = _pack_encoder_params(hr_params), _pack_encoder_params(tail_params)
    return {
        "wqkv": jnp.concatenate([a["wqkv"], b["wqkv"]], axis=0),   # [G*L, H, 3*NH*128]
        "wo": jnp.concatenate([a["wo"], b["wo"]], axis=0),         # [G*L, NH*128, H]
        "w1": jnp.concatenate([a["w1"], b["w1"]], axis=0),         # [G*L, H, I]
        "w2": jnp.concatenate([a["w2"], b["w2"]], axis=0),         # [G*L, I, H]
        "slab": jnp.stack([a["slab"], b["slab"]]),                 # [G, 2+13L, 128]
        "word_emb": jnp.stack([a["word_emb"], b["word_emb"]]),
        "pos_emb": jnp.stack([a["pos_emb"], b["pos_emb"]]),
        "type_emb": jnp.stack([a["type_emb"], b["type_emb"]]),
    }


# --------------------------------- forward ---------------------------------
def custom_bert_forward(packed,
                        hr_token_ids, hr_mask, hr_token_type_ids,
                        tail_token_ids, tail_mask, tail_token_type_ids,
                        head_token_ids, head_mask, head_token_type_ids):
    B, S = hr_token_ids.shape
    H, NH, DH, I, L = HIDDEN, N_HEADS, HEAD_DIM, INTERMEDIATE, N_LAYERS
    G = 2
    Bp = 2 * B                   # group 1 = [tail; head]; group 0 (hr) padded to match
    R = Bp * S
    RS = NH * R

    def pad_rows(x):
        pad = jnp.zeros((Bp - x.shape[0],) + x.shape[1:], x.dtype)
        return jnp.concatenate([x, pad], axis=0)

    ids = jnp.stack([pad_rows(hr_token_ids),
                     jnp.concatenate([tail_token_ids, head_token_ids], axis=0)])
    masks = jnp.stack([pad_rows(hr_mask),
                       jnp.concatenate([tail_mask, head_mask], axis=0)])
    types = jnp.stack([pad_rows(hr_token_type_ids),
                       jnp.concatenate([tail_token_type_ids, head_token_type_ids], axis=0)])

    # Embedding gather stays in XLA (tiny data-dependent gather).
    word = jax.vmap(lambda tbl, i: jnp.take(tbl, i, axis=0))(packed["word_emb"], ids)
    typ = jax.vmap(lambda tbl, i: jnp.take(tbl, i, axis=0))(packed["type_emb"], types)
    pos = packed["pos_emb"][:, :S][:, None, :, :]
    emb = (word + typ + pos).reshape(G * R, H)                         # [G*R, H]

    mask_f = masks.astype(jnp.float32)                                 # [G, Bp, S]
    # additive key-mask bias, tiled over heads (stack order: head-major, batch, seq)
    key_bias = jnp.tile(((1.0 - mask_f) * -10000.0).reshape(G, 1, R), (1, 1, NH))
    # block-diagonal structure over the NH*Bp blocks of size S (built once, reused per layer)
    blk_ids = jnp.repeat(jnp.arange(NH * Bp, dtype=jnp.int32), S)      # [RS]
    same_blk = blk_ids[:, None] == blk_ids[None, :]                    # [RS, RS]
    attn_bias = jnp.where(same_blk[None], key_bias, jnp.float32(-1e9)) # [G, RS, RS]

    # masked-mean pooling matrix (mask / clamp(sum_mask, 1e-4)), block-diagonal
    denom = jnp.maximum(mask_f.sum(axis=-1, keepdims=True), 1e-4)
    mw = mask_f / denom                                                # [G, Bp, S]
    eye = jnp.eye(Bp, dtype=jnp.float32)
    poolmat = (eye[None, :, :, None] * mw[:, None, :, :]).reshape(G, Bp, R)

    vec_rows = packed["slab"].shape[1]
    kernel = functools.partial(_encoder_kernel, Bp=Bp, S=S, H=H, NH=NH, DH=DH,
                               I=I, L=L, eps=LN_EPS)

    out = pl.pallas_call(
        kernel,
        out_shape=jax.ShapeDtypeStruct((G, Bp, LANE), jnp.float32),
        grid=(G,),
        in_specs=[
            pl.BlockSpec((R, H), lambda g: (g, 0)),                     # embeddings
            pl.BlockSpec((1, RS, RS), lambda g: (g, 0, 0)),             # attention bias
            pl.BlockSpec((1, Bp, R), lambda g: (g, 0, 0)),              # pooling matrix
            pl.BlockSpec((L, H, 3 * NH * LANE), lambda g: (g, 0, 0)),   # fused QKV (slotted)
            pl.BlockSpec((L, NH * LANE, H), lambda g: (g, 0, 0)),       # Wo (slotted)
            pl.BlockSpec((L, H, I), lambda g: (g, 0, 0)),               # FFN W1
            pl.BlockSpec((L, I, H), lambda g: (g, 0, 0)),               # FFN W2
            pl.BlockSpec((1, vec_rows, LANE), lambda g: (g, 0, 0)),     # packed vector slab
        ],
        out_specs=pl.BlockSpec((1, Bp, LANE), lambda g: (g, 0, 0)),
        compiler_params=pltpu.CompilerParams(
            dimension_semantics=("parallel",)),                          # v7x: 2 TCs
    )(emb, attn_bias, poolmat, packed["wqkv"], packed["wo"],
      packed["w1"], packed["w2"], packed["slab"])

    vecs = out[..., :H]                                                 # [G, Bp, H]
    return {"hr_vector": vecs[0, :B],
            "tail_vector": vecs[1, :B],
            "head_vector": vecs[1, B:2 * B]}

# TODO(synk): compute_logits / pre-batch buffer mutation / BCE loss /
# entities.json lookup are training-time utilities outside forward(); not ported.


if __name__ == "__main__":
    B, S = 2, 8
    key = jax.random.PRNGKey(0)
    k_param, k_hr, k_tail, k_head = jax.random.split(key, 4)

    hr_params = init_bert_params(k_param)
    # tail_bert = deepcopy(hr_bert): separate parameter tree with identical values.
    tail_params = jax.tree_util.tree_map(lambda x: x + 0.0, hr_params)

    packed = pack_model_params(hr_params, tail_params)   # one-off init-time packing

    def make_inputs(k):
        ids = jax.random.randint(k, (B, S), 0, VOCAB, dtype=jnp.int32)
        mask = jnp.array([[1] * S, [1] * (S - 3) + [0] * 3], dtype=jnp.int32)
        types = jnp.zeros((B, S), dtype=jnp.int32)
        return ids, mask, types

    hr_in = make_inputs(k_hr)
    tail_in = make_inputs(k_tail)
    head_in = make_inputs(k_head)

    fwd = jax.jit(custom_bert_forward)
    out = fwd(packed, *hr_in, *tail_in, *head_in)
    jax.block_until_ready(out)

    assert out["hr_vector"].shape == (B, HIDDEN)
    assert out["tail_vector"].shape == (B, HIDDEN)
    assert out["head_vector"].shape == (B, HIDDEN)
    for v in out.values():
        assert bool(jnp.all(jnp.isfinite(v)))
    print("KERNEL_OK")
</pallas_src>

<mosaic_0001>
module attributes {stable_mosaic.version = 11 : i64} {
  func.func @_encoder_kernel(%arg0: i32, %arg1: memref<32x32xf32, #tpu.memory_space<vmem>>, %arg2: memref<1x64x64xf32, #tpu.memory_space<vmem>>, %arg3: memref<1x4x32xf32, #tpu.memory_space<vmem>>, %arg4: memref<2x32x768xf32, #tpu.memory_space<vmem>>, %arg5: memref<2x256x32xf32, #tpu.memory_space<vmem>>, %arg6: memref<2x32x64xf32, #tpu.memory_space<vmem>>, %arg7: memref<2x64x32xf32, #tpu.memory_space<vmem>>, %arg8: memref<1x28x128xf32, #tpu.memory_space<vmem>>, %arg9: memref<1x4x128xf32, #tpu.memory_space<vmem>>) attributes {dimension_semantics = [#tpu.dimension_semantics<parallel>], iteration_bounds = array<i64: 2>, scalar_prefetch = 0 : i64, scratch_operands = 0 : i64, tpu.core_type = #tpu.core_type<tc>, window_params = [{transform_indices = @transform_0, window_bounds = array<i64: 32, 32>}, {transform_indices = @transform_1, window_bounds = array<i64: 1, 64, 64>}, {transform_indices = @transform_2, window_bounds = array<i64: 1, 4, 32>}, {transform_indices = @transform_3, window_bounds = array<i64: 2, 32, 768>}, {transform_indices = @transform_4, window_bounds = array<i64: 2, 256, 32>}, {transform_indices = @transform_5, window_bounds = array<i64: 2, 32, 64>}, {transform_indices = @transform_6, window_bounds = array<i64: 2, 64, 32>}, {transform_indices = @transform_7, window_bounds = array<i64: 1, 28, 128>}, {transform_indices = @transform_8, window_bounds = array<i64: 1, 4, 128>}]} {
    %c0 = arith.constant 0 : index
    %c0_0 = arith.constant 0 : index
    %c0_1 = arith.constant 0 : index
    %0 = vector.load %arg8[%c0, %c0_0, %c0_1] : memref<1x28x128xf32, #tpu.memory_space<vmem>>, vector<1x28x128xf32>
    %1 = vector.shape_cast %0 : vector<1x28x128xf32> to vector<28x128xf32>
    %c0_2 = arith.constant 0 : index
    %c0_3 = arith.constant 0 : index
    %c0_4 = arith.constant 0 : index
    %2 = vector.load %arg2[%c0_2, %c0_3, %c0_4] : memref<1x64x64xf32, #tpu.memory_space<vmem>>, vector<1x64x64xf32>
    %3 = vector.shape_cast %2 : vector<1x64x64xf32> to vector<64x64xf32>
    %c0_5 = arith.constant 0 : index
    %c0_6 = arith.constant 0 : index
    %c0_7 = arith.constant 0 : index
    %4 = vector.load %arg3[%c0_5, %c0_6, %c0_7] : memref<1x4x32xf32, #tpu.memory_space<vmem>>, vector<1x4x32xf32>
    %5 = vector.shape_cast %4 : vector<1x4x32xf32> to vector<4x32xf32>
    %c0_8 = arith.constant 0 : index
    %c0_9 = arith.constant 0 : index
    %6 = vector.load %arg1[%c0_8, %c0_9] : memref<32x32xf32, #tpu.memory_space<vmem>>, vector<32x32xf32>
    %7 = vector.extract_strided_slice %1 {offsets = [0, 0], sizes = [1, 128], strides = [1, 1]} : vector<28x128xf32> to vector<1x128xf32>
    %8 = vector.extract_strided_slice %1 {offsets = [1, 0], sizes = [1, 128], strides = [1, 1]} : vector<28x128xf32> to vector<1x128xf32>
    %cst = arith.constant dense<0.000000e+00> : vector<32xf32>
    %9 = vector.multi_reduction <add>, %6, %cst [1] : vector<32x32xf32> to vector<32xf32>
    %10 = vector.shape_cast %9 : vector<32xf32> to vector<32x1xf32>
    %cst_10 = arith.constant 3.200000e+01 : f32
    %11 = vector.broadcast %cst_10 : f32 to vector<32x1xf32>
    %12 = arith.divf %10, %11 : vector<32x1xf32>
    %13 = vector.broadcast %12 : vector<32x1xf32> to vector<32x32xf32>
    %14 = arith.subf %6, %13 : vector<32x32xf32>
    %15 = arith.mulf %14, %14 : vector<32x32xf32>
    %cst_11 = arith.constant dense<0.000000e+00> : vector<32xf32>
    %16 = vector.multi_reduction <add>, %15, %cst_11 [1] : vector<32x32xf32> to vector<32xf32>
    %17 = vector.shape_cast %16 : vector<32xf32> to vector<32x1xf32>
    %cst_12 = arith.constant 3.200000e+01 : f32
    %18 = vector.broadcast %cst_12 : f32 to vector<32x1xf32>
    %19 = arith.divf %17, %18 : vector<32x1xf32>
    %cst_13 = arith.constant 9.99999996E-13 : f32
    %20 = vector.broadcast %cst_13 : f32 to vector<32x1xf32>
    %21 = arith.addf %19, %20 : vector<32x1xf32>
    %22 = math.rsqrt %21 : vector<32x1xf32>
    %23 = vector.broadcast %22 : vector<32x1xf32> to vector<32x32xf32>
    %24 = arith.mulf %14, %23 : vector<32x32xf32>
    %25 = vector.extract_strided_slice %7 {offsets = [0, 0], sizes = [1, 32], strides = [1, 1]} : vector<1x128xf32> to vector<1x32xf32>
    %26 = vector.broadcast %25 : vector<1x32xf32> to vector<32x32xf32>
    %27 = arith.mulf %24, %26 : vector<32x32xf32>
    %28 = vector.extract_strided_slice %8 {offsets = [0, 0], sizes = [1, 32], strides = [1, 1]} : vector<1x128xf32> to vector<1x32xf32>
    %29 = vector.broadcast %28 : vector<1x32xf32> to vector<32x32xf32>
    %30 = arith.addf %27, %29 : vector<32x32xf32>
    %c0_14 = arith.constant 0 : index
    %c0_15 = arith.constant 0 : index
    %c0_16 = arith.constant 0 : index
    %31 = vector.load %arg4[%c0_14, %c0_15, %c0_16] : memref<2x32x768xf32, #tpu.memory_space<vmem>>, vector<1x32x768xf32>
    %32 = vector.shape_cast %31 : vector<1x32x768xf32> to vector<32x768xf32>
    %cst_17 = arith.constant dense<0.000000e+00> : vector<32x768xf32>
    %33 = tpu.matmul %30, %32, %cst_17 {dimension_numbers = #tpu.dot_dimension_numbers<[1], [0], [0], [1], [0, 0, 1, 1], [], []>} : vector<32x32xf32>, vector<32x768xf32>, vector<32x768xf32> -> vector<32x768xf32>
    %34 = vector.extract_strided_slice %33 {offsets = [0, 0], sizes = [32, 128], strides = [1, 1]} : vector<32x768xf32> to vector<32x128xf32>
    %35 = vector.extract_strided_slice %1 {offsets = [2, 0], sizes = [1, 128], strides = [1, 1]} : vector<28x128xf32> to vector<1x128xf32>
    %36 = vector.broadcast %35 : vector<1x128xf32> to vector<32x128xf32>
    %37 = arith.addf %34, %36 : vector<32x128xf32>
    %38 = vector.extract_strided_slice %33 {offsets = [0, 384], sizes = [32, 128], strides = [1, 1]} : vector<32x768xf32> to vector<32x128xf32>
    %39 = vector.extract_strided_slice %1 {offsets = [5, 0], sizes = [1, 128], strides = [1, 1]} : vector<28x128xf32> to vector<1x128xf32>
    %40 = vector.broadcast %39 : vector<1x128xf32> to vector<32x128xf32>
    %41 = arith.addf %38, %40 : vector<32x128xf32>
    %42 = tpu.concatenate %37, %41 in 0 : vector<32x128xf32>, vector<32x128xf32> -> vector<64x128xf32>
    %43 = vector.extract_strided_slice %33 {offsets = [0, 128], sizes = [32, 128], strides = [1, 1]} : vector<32x768xf32> to vector<32x128xf32>
    %44 = vector.extract_strided_slice %1 {offsets = [3, 0], sizes = [1, 128], strides = [1, 1]} : vector<28x128xf32> to vector<1x128xf32>
    %45 = vector.broadcast %44 : vector<1x128xf32> to vector<32x128xf32>
    %46 = arith.addf %43, %45 : vector<32x128xf32>
    %47 = vector.extract_strided_slice %33 {offsets = [0, 512], sizes = [32, 128], strides = [1, 1]} : vector<32x768xf32> to vector<32x128xf32>
    %48 = vector.extract_strided_slice %1 {offsets = [6, 0], sizes = [1, 128], strides = [1, 1]} : vector<28x128xf32> to vector<1x128xf32>
    %49 = vector.broadcast %48 : vector<1x128xf32> to vector<32x128xf32>
    %50 = arith.addf %47, %49 : vector<32x128xf32>
    %51 = tpu.concatenate %46, %50 in 0 : vector<32x128xf32>, vector<32x128xf32> -> vector<64x128xf32>
    %52 = vector.extract_strided_slice %33 {offsets = [0, 256], sizes = [32, 128], strides = [1, 1]} : vector<32x768xf32> to vector<32x128xf32>
    %53 = vector.extract_strided_slice %1 {offsets = [4, 0], sizes = [1, 128], strides = [1, 1]} : vector<28x128xf32> to vector<1x128xf32>
    %54 = vector.broadcast %53 : vector<1x128xf32> to vector<32x128xf32>
    %55 = arith.addf %52, %54 : vector<32x128xf32>
    %56 = vector.extract_strided_slice %33 {offsets = [0, 640], sizes = [32, 128], strides = [1, 1]} : vector<32x768xf32> to vector<32x128xf32>
    %57 = vector.extract_strided_slice %1 {offsets = [7, 0], sizes = [1, 128], strides = [1, 1]} : vector<28x128xf32> to vector<1x128xf32>
    %58 = vector.broadcast %57 : vector<1x128xf32> to vector<32x128xf32>
    %59 = arith.addf %56, %58 : vector<32x128xf32>
    %60 = tpu.concatenate %55, %59 in 0 : vector<32x128xf32>, vector<32x128xf32> -> vector<64x128xf32>
    %cst_18 = arith.constant dense<0.000000e+00> : vector<64x64xf32>
    %61 = tpu.matmul %42, %51, %cst_18 {dimension_numbers = #tpu.dot_dimension_numbers<[1], [1], [0], [0], [0, 0, 1, 0], [], []>} : vector<64x128xf32>, vector<64x128xf32>, vector<64x64xf32> -> vector<64x64xf32>
    %cst_19 = arith.constant 2.500000e-01 : f32
    %62 = vector.broadcast %cst_19 : f32 to vector<64x64xf32>
    %63 = arith.mulf %61, %62 : vector<64x64xf32>
    %64 = arith.addf %63, %3 : vector<64x64xf32>
    %cst_20 = arith.constant dense<0xFF800000> : vector<64xf32>
    %65 = vector.multi_reduction <maximumf>, %64, %cst_20 [1] : vector<64x64xf32> to vector<64xf32>
    %66 = vector.shape_cast %65 : vector<64xf32> to vector<64x1xf32>
    %67 = vector.broadcast %66 : vector<64x1xf32> to vector<64x64xf32>
    %68 = arith.subf %64, %67 : vector<64x64xf32>
    %69 = math.exp %68 : vector<64x64xf32>
    %cst_21 = arith.constant dense<0.000000e+00> : vector<64xf32>
    %70 = vector.multi_reduction <add>, %69, %cst_21 [1] : vector<64x64xf32> to vector<64xf32>
    %71 = vector.shape_cast %70 : vector<64xf32> to vector<64x1xf32>
    %72 = vector.broadcast %71 : vector<64x1xf32> to vector<64x64xf32>
    %73 = arith.divf %69, %72 : vector<64x64xf32>
    %cst_22 = arith.constant dense<0.000000e+00> : vector<64x128xf32>
    %74 = tpu.matmul %73, %60, %cst_22 {dimension_numbers = #tpu.dot_dimension_numbers<[1], [0], [0], [1], [0, 0, 1, 1], [], []>} : vector<64x64xf32>, vector<64x128xf32>, vector<64x128xf32> -> vector<64x128xf32>
    %75 = vector.extract_strided_slice %74 {offsets = [0, 0], sizes = [32, 128], strides = [1, 1]} : vector<64x128xf32> to vector<32x128xf32>
    %76 = vector.extract_strided_slice %74 {offsets = [32, 0], sizes = [32, 128], strides = [1, 1]} : vector<64x128xf32> to vector<32x128xf32>
    %77 = tpu.concatenate %75, %76 in 1 : vector<32x128xf32>, vector<32x128xf32> -> vector<32x256xf32>
    %c0_23 = arith.constant 0 : index
    %c0_24 = arith.constant 0 : index
    %c0_25 = arith.constant 0 : index
    %78 = vector.load %arg5[%c0_23, %c0_24, %c0_25] : memref<2x256x32xf32, #tpu.memory_space<vmem>>, vector<1x256x32xf32>
    %79 = vector.shape_cast %78 : vector<1x256x32xf32> to vector<256x32xf32>
    %cst_26 = arith.constant dense<0.000000e+00> : vector<32x32xf32>
    %80 = tpu.matmul %77, %79, %cst_26 {dimension_numbers = #tpu.dot_dimension_numbers<[1], [0], [0], [1], [0, 0, 1, 1], [], []>} : vector<32x256xf32>, vector<256x32xf32>, vector<32x32xf32> -> vector<32x32xf32>
    %81 = vector.extract_strided_slice %1 {offsets = [8, 0], sizes = [1, 32], strides = [1, 1]} : vector<28x128xf32> to vector<1x32xf32>
    %82 = vector.broadcast %81 : vector<1x32xf32> to vector<32x32xf32>
    %83 = arith.addf %80, %82 : vector<32x32xf32>
    %84 = arith.addf %30, %83 : vector<32x32xf32>
    %85 = vector.extract_strided_slice %1 {offsets = [11, 0], sizes = [1, 128], strides = [1, 1]} : vector<28x128xf32> to vector<1x128xf32>
    %86 = vector.extract_strided_slice %1 {offsets = [12, 0], sizes = [1, 128], strides = [1, 1]} : vector<28x128xf32> to vector<1x128xf32>
    %cst_27 = arith.constant dense<0.000000e+00> : vector<32xf32>
    %87 = vector.multi_reduction <add>, %84, %cst_27 [1] : vector<32x32xf32> to vector<32xf32>
    %88 = vector.shape_cast %87 : vector<32xf32> to vector<32x1xf32>
    %cst_28 = arith.constant 3.200000e+01 : f32
    %89 = vector.broadcast %cst_28 : f32 to vector<32x1xf32>
    %90 = arith.divf %88, %89 : vector<32x1xf32>
    %91 = vector.broadcast %90 : vector<32x1xf32> to vector<32x32xf32>
    %92 = arith.subf %84, %91 : vector<32x32xf32>
    %93 = arith.mulf %92, %92 : vector<32x32xf32>
    %cst_29 = arith.constant dense<0.000000e+00> : vector<32xf32>
    %94 = vector.multi_reduction <add>, %93, %cst_29 [1] : vector<32x32xf32> to vector<32xf32>
    %95 = vector.shape_cast %94 : vector<32xf32> to vector<32x1xf32>
    %cst_30 = arith.constant 3.200000e+01 : f32
    %96 = vector.broadcast %cst_30 : f32 to vector<32x1xf32>
    %97 = arith.divf %95, %96 : vector<32x1xf32>
    %cst_31 = arith.constant 9.99999996E-13 : f32
    %98 = vector.broadcast %cst_31 : f32 to vector<32x1xf32>
    %99 = arith.addf %97, %98 : vector<32x1xf32>
    %100 = math.rsqrt %99 : vector<32x1xf32>
    %101 = vector.broadcast %100 : vector<32x1xf32> to vector<32x32xf32>
    %102 = arith.mulf %92, %101 : vector<32x32xf32>
    %103 = vector.extract_strided_slice %85 {offsets = [0, 0], sizes = [1, 32], strides = [1, 1]} : vector<1x128xf32> to vector<1x32xf32>
    %104 = vector.broadcast %103 : vector<1x32xf32> to vector<32x32xf32>
    %105 = arith.mulf %102, %104 : vector<32x32xf32>
    %106 = vector.extract_strided_slice %86 {offsets = [0, 0], sizes = [1, 32], strides = [1, 1]} : vector<1x128xf32> to vector<1x32xf32>
    %107 = vector.broadcast %106 : vector<1x32xf32> to vector<32x32xf32>
    %108 = arith.addf %105, %107 : vector<32x32xf32>
    %c0_32 = arith.constant 0 : index
    %c0_33 = arith.constant 0 : index
    %c0_34 = arith.constant 0 : index
    %109 = vector.load %arg6[%c0_32, %c0_33, %c0_34] : memref<2x32x64xf32, #tpu.memory_space<vmem>>, vector<1x32x64xf32>
    %110 = vector.shape_cast %109 : vector<1x32x64xf32> to vector<32x64xf32>
    %cst_35 = arith.constant dense<0.000000e+00> : vector<32x64xf32>
    %111 = tpu.matmul %108, %110, %cst_35 {dimension_numbers = #tpu.dot_dimension_numbers<[1], [0], [0], [1], [0, 0, 1, 1], [], []>} : vector<32x32xf32>, vector<32x64xf32>, vector<32x64xf32> -> vector<32x64xf32>
    %112 = vector.extract_strided_slice %1 {offsets = [9, 0], sizes = [1, 64], strides = [1, 1]} : vector<28x128xf32> to vector<1x64xf32>
    %113 = vector.broadcast %112 : vector<1x64xf32> to vector<32x64xf32>
    %114 = arith.addf %111, %113 : vector<32x64xf32>
    %cst_36 = arith.constant 5.000000e-01 : f32
    %115 = vector.broadcast %cst_36 : f32 to vector<32x64xf32>
    %116 = arith.mulf %115, %114 : vector<32x64xf32>
    %cst_37 = arith.constant 4.471500e-02 : f32
    %117 = vector.broadcast %cst_37 : f32 to vector<32x64xf32>
    %118 = arith.mulf %117, %114 : vector<32x64xf32>
    %119 = arith.mulf %118, %114 : vector<32x64xf32>
    %120 = arith.mulf %119, %114 : vector<32x64xf32>
    %121 = arith.addf %114, %120 : vector<32x64xf32>
    %cst_38 = arith.constant 0.797884583 : f32
    %122 = vector.broadcast %cst_38 : f32 to vector<32x64xf32>
    %123 = arith.mulf %122, %121 : vector<32x64xf32>
    %124 = math.tanh %123 : vector<32x64xf32>
    %cst_39 = arith.constant 1.000000e+00 : f32
    %125 = vector.broadcast %cst_39 : f32 to vector<32x64xf32>
    %126 = arith.addf %125, %124 : vector<32x64xf32>
    %127 = arith.mulf %116, %126 : vector<32x64xf32>
    %c0_40 = arith.constant 0 : index
    %c0_41 = arith.constant 0 : index
    %c0_42 = arith.constant 0 : index
    %128 = vector.load %arg7[%c0_40, %c0_41, %c0_42] : memref<2x64x32xf32, #tpu.memory_space<vmem>>, vector<1x64x32xf32>
    %129 = vector.shape_cast %128 : vector<1x64x32xf32> to vector<64x32xf32>
    %cst_43 = arith.constant dense<0.000000e+00> : vector<32x32xf32>
    %130 = tpu.matmul %127, %129, %cst_43 {dimension_numbers = #tpu.dot_dimension_numbers<[1], [0], [0], [1], [0, 0, 1, 1], [], []>} : vector<32x64xf32>, vector<64x32xf32>, vector<32x32xf32> -> vector<32x32xf32>
    %131 = vector.extract_strided_slice %1 {offsets = [10, 0], sizes = [1, 32], strides = [1, 1]} : vector<28x128xf32> to vector<1x32xf32>
    %132 = vector.broadcast %131 : vector<1x32xf32> to vector<32x32xf32>
    %133 = arith.addf %130, %132 : vector<32x32xf32>
    %134 = arith.addf %108, %133 : vector<32x32xf32>
    %135 = vector.extract_strided_slice %1 {offsets = [13, 0], sizes = [1, 128], strides = [1, 1]} : vector<28x128xf32> to vector<1x128xf32>
    %136 = vector.extract_strided_slice %1 {offsets = [14, 0], sizes = [1, 128], strides = [1, 1]} : vector<28x128xf32> to vector<1x128xf32>
    %cst_44 = arith.constant dense<0.000000e+00> : vector<32xf32>
    %137 = vector.multi_reduction <add>, %134, %cst_44 [1] : vector<32x32xf32> to vector<32xf32>
    %138 = vector.shape_cast %137 : vector<32xf32> to vector<32x1xf32>
    %cst_45 = arith.constant 3.200000e+01 : f32
    %139 = vector.broadcast %cst_45 : f32 to vector<32x1xf32>
    %140 = arith.divf %138, %139 : vector<32x1xf32>
    %141 = vector.broadcast %140 : vector<32x1xf32> to vector<32x32xf32>
    %142 = arith.subf %134, %141 : vector<32x32xf32>
    %143 = arith.mulf %142, %142 : vector<32x32xf32>
    %cst_46 = arith.constant dense<0.000000e+00> : vector<32xf32>
    %144 = vector.multi_reduction <add>, %143, %cst_46 [1] : vector<32x32xf32> to vector<32xf32>
    %145 = vector.shape_cast %144 : vector<32xf32> to vector<32x1xf32>
    %cst_47 = arith.constant 3.200000e+01 : f32
    %146 = vector.broadcast %cst_47 : f32 to vector<32x1xf32>
    %147 = arith.divf %145, %146 : vector<32x1xf32>
    %cst_48 = arith.constant 9.99999996E-13 : f32
    %148 = vector.broadcast %cst_48 : f32 to vector<32x1xf32>
    %149 = arith.addf %147, %148 : vector<32x1xf32>
    %150 = math.rsqrt %149 : vector<32x1xf32>
    %151 = vector.broadcast %150 : vector<32x1xf32> to vector<32x32xf32>
    %152 = arith.mulf %142, %151 : vector<32x32xf32>
    %153 = vector.extract_strided_slice %135 {offsets = [0, 0], sizes = [1, 32], strides = [1, 1]} : vector<1x128xf32> to vector<1x32xf32>
    %154 = vector.broadcast %153 : vector<1x32xf32> to vector<32x32xf32>
    %155 = arith.mulf %152, %154 : vector<32x32xf32>
    %156 = vector.extract_strided_slice %136 {offsets = [0, 0], sizes = [1, 32], strides = [1, 1]} : vector<1x128xf32> to vector<1x32xf32>
    %157 = vector.broadcast %156 : vector<1x32xf32> to vector<32x32xf32>
    %158 = arith.addf %155, %157 : vector<32x32xf32>
    %c1 = arith.constant 1 : index
    %c0_49 = arith.constant 0 : index
    %c0_50 = arith.constant 0 : index
    %159 = vector.load %arg4[%c1, %c0_49, %c0_50] : memref<2x32x768xf32, #tpu.memory_space<vmem>>, vector<1x32x768xf32>
    %160 = vector.shape_cast %159 : vector<1x32x768xf32> to vector<32x768xf32>
    %cst_51 = arith.constant dense<0.000000e+00> : vector<32x768xf32>
    %161 = tpu.matmul %158, %160, %cst_51 {dimension_numbers = #tpu.dot_dimension_numbers<[1], [0], [0], [1], [0, 0, 1, 1], [], []>} : vector<32x32xf32>, vector<32x768xf32>, vector<32x768xf32> -> vector<32x768xf32>
    %162 = vector.extract_strided_slice %161 {offsets = [0, 0], sizes = [32, 128], strides = [1, 1]} : vector<32x768xf32> to vector<32x128xf32>
    %163 = vector.extract_strided_slice %1 {offsets = [15, 0], sizes = [1, 128], strides = [1, 1]} : vector<28x128xf32> to vector<1x128xf32>
    %164 = vector.broadcast %163 : vector<1x128xf32> to vector<32x128xf32>
    %165 = arith.addf %162, %164 : vector<32x128xf32>
    %166 = vector.extract_strided_slice %161 {offsets = [0, 384], sizes = [32, 128], strides = [1, 1]} : vector<32x768xf32> to vector<32x128xf32>
    %167 = vector.extract_strided_slice %1 {offsets = [18, 0], sizes = [1, 128], strides = [1, 1]} : vector<28x128xf32> to vector<1x128xf32>
    %168 = vector.broadcast %167 : vector<1x128xf32> to vector<32x128xf32>
    %169 = arith.addf %166, %168 : vector<32x128xf32>
    %170 = tpu.concatenate %165, %169 in 0 : vector<32x128xf32>, vector<32x128xf32> -> vector<64x128xf32>
    %171 = vector.extract_strided_slice %161 {offsets = [0, 128], sizes = [32, 128], strides = [1, 1]} : vector<32x768xf32> to vector<32x128xf32>
    %172 = vector.extract_strided_slice %1 {offsets = [16, 0], sizes = [1, 128], strides = [1, 1]} : vector<28x128xf32> to vector<1x128xf32>
    %173 = vector.broadcast %172 : vector<1x128xf32> to vector<32x128xf32>
    %174 = arith.addf %171, %173 : vector<32x128xf32>
    %175 = vector.extract_strided_slice %161 {offsets = [0, 512], sizes = [32, 128], strides = [1, 1]} : vector<32x768xf32> to vector<32x128xf32>
    %176 = vector.extract_strided_slice %1 {offsets = [19, 0], sizes = [1, 128], strides = [1, 1]} : vector<28x128xf32> to vector<1x128xf32>
    %177 = vector.broadcast %176 : vector<1x128xf32> to vector<32x128xf32>
    %178 = arith.addf %175, %177 : vector<32x128xf32>
    %179 = tpu.concatenate %174, %178 in 0 : vector<32x128xf32>, vector<32x128xf32> -> vector<64x128xf32>
    %180 = vector.extract_strided_slice %161 {offsets = [0, 256], sizes = [32, 128], strides = [1, 1]} : vector<32x768xf32> to vector<32x128xf32>
    %181 = vector.extract_strided_slice %1 {offsets = [17, 0], sizes = [1, 128], strides = [1, 1]} : vector<28x128xf32> to vector<1x128xf32>
    %182 = vector.broadcast %181 : vector<1x128xf32> to vector<32x128xf32>
    %183 = arith.addf %180, %182 : vector<32x128xf32>
    %184 = vector.extract_strided_slice %161 {offsets = [0, 640], sizes = [32, 128], strides = [1, 1]} : vector<32x768xf32> to vector<32x128xf32>
    %185 = vector.extract_strided_slice %1 {offsets = [20, 0], sizes = [1, 128], strides = [1, 1]} : vector<28x128xf32> to vector<1x128xf32>
    %186 = vector.broadcast %185 : vector<1x128xf32> to vector<32x128xf32>
    %187 = arith.addf %184, %186 : vector<32x128xf32>
    %188 = tpu.concatenate %183, %187 in 0 : vector<32x128xf32>, vector<32x128xf32> -> vector<64x128xf32>
    %cst_52 = arith.constant dense<0.000000e+00> : vector<64x64xf32>
    %189 = tpu.matmul %170, %179, %cst_52 {dimension_numbers = #tpu.dot_dimension_numbers<[1], [1], [0], [0], [0, 0, 1, 0], [], []>} : vector<64x128xf32>, vector<64x128xf32>, vector<64x64xf32> -> vector<64x64xf32>
    %cst_53 = arith.constant 2.500000e-01 : f32
    %190 = vector.broadcast %cst_53 : f32 to vector<64x64xf32>
    %191 = arith.mulf %189, %190 : vector<64x64xf32>
    %192 = arith.addf %191, %3 : vector<64x64xf32>
    %cst_54 = arith.constant dense<0xFF800000> : vector<64xf32>
    %193 = vector.multi_reduction <maximumf>, %192, %cst_54 [1] : vector<64x64xf32> to vector<64xf32>
    %194 = vector.shape_cast %193 : vector<64xf32> to vector<64x1xf32>
    %195 = vector.broadcast %194 : vector<64x1xf32> to vector<64x64xf32>
    %196 = arith.subf %192, %195 : vector<64x64xf32>
    %197 = math.exp %196 : vector<64x64xf32>
    %cst_55 = arith.constant dense<0.000000e+00> : vector<64xf32>
    %198 = vector.multi_reduction <add>, %197, %cst_55 [1] : vector<64x64xf32> to vector<64xf32>
    %199 = vector.shape_cast %198 : vector<64xf32> to vector<64x1xf32>
    %200 = vector.broadcast %199 : vector<64x1xf32> to vector<64x64xf32>
    %201 = arith.divf %197, %200 : vector<64x64xf32>
    %cst_56 = arith.constant dense<0.000000e+00> : vector<64x128xf32>
    %202 = tpu.matmul %201, %188, %cst_56 {dimension_numbers = #tpu.dot_dimension_numbers<[1], [0], [0], [1], [0, 0, 1, 1], [], []>} : vector<64x64xf32>, vector<64x128xf32>, vector<64x128xf32> -> vector<64x128xf32>
    %203 = vector.extract_strided_slice %202 {offsets = [0, 0], sizes = [32, 128], strides = [1, 1]} : vector<64x128xf32> to vector<32x128xf32>
    %204 = vector.extract_strided_slice %202 {offsets = [32, 0], sizes = [32, 128], strides = [1, 1]} : vector<64x128xf32> to vector<32x128xf32>
    %205 = tpu.concatenate %203, %204 in 1 : vector<32x128xf32>, vector<32x128xf32> -> vector<32x256xf32>
    %c1_57 = arith.constant 1 : index
    %c0_58 = arith.constant 0 : index
    %c0_59 = arith.constant 0 : index
    %206 = vector.load %arg5[%c1_57, %c0_58, %c0_59] : memref<2x256x32xf32, #tpu.memory_space<vmem>>, vector<1x256x32xf32>
    %207 = vector.shape_cast %206 : vector<1x256x32xf32> to vector<256x32xf32>
    %cst_60 = arith.constant dense<0.000000e+00> : vector<32x32xf32>
    %208 = tpu.matmul %205, %207, %cst_60 {dimension_numbers = #tpu.dot_dimension_numbers<[1], [0], [0], [1], [0, 0, 1, 1], [], []>} : vector<32x256xf32>, vector<256x32xf32>, vector<32x32xf32> -> vector<32x32xf32>
    %209 = vector.extract_strided_slice %1 {offsets = [21, 0], sizes = [1, 32], strides = [1, 1]} : vector<28x128xf32> to vector<1x32xf32>
    %210 = vector.broadcast %209 : vector<1x32xf32> to vector<32x32xf32>
    %211 = arith.addf %208, %210 : vector<32x32xf32>
    %212 = arith.addf %158, %211 : vector<32x32xf32>
    %213 = vector.extract_strided_slice %1 {offsets = [24, 0], sizes = [1, 128], strides = [1, 1]} : vector<28x128xf32> to vector<1x128xf32>
    %214 = vector.extract_strided_slice %1 {offsets = [25, 0], sizes = [1, 128], strides = [1, 1]} : vector<28x128xf32> to vector<1x128xf32>
    %cst_61 = arith.constant dense<0.000000e+00> : vector<32xf32>
    %215 = vector.multi_reduction <add>, %212, %cst_61 [1] : vector<32x32xf32> to vector<32xf32>
    %216 = vector.shape_cast %215 : vector<32xf32> to vector<32x1xf32>
    %cst_62 = arith.constant 3.200000e+01 : f32
    %217 = vector.broadcast %cst_62 : f32 to vector<32x1xf32>
    %218 = arith.divf %216, %217 : vector<32x1xf32>
    %219 = vector.broadcast %218 : vector<32x1xf32> to vector<32x32xf32>
    %220 = arith.subf %212, %219 : vector<32x32xf32>
    %221 = arith.mulf %220, %220 : vector<32x32xf32>
    %cst_63 = arith.constant dense<0.000000e+00> : vector<32xf32>
    %222 = vector.multi_reduction <add>, %221, %cst_63 [1] : vector<32x32xf32> to vector<32xf32>
    %223 = vector.shape_cast %222 : vector<32xf32> to vector<32x1xf32>
    %cst_64 = arith.constant 3.200000e+01 : f32
    %224 = vector.broadcast %cst_64 : f32 to vector<32x1xf32>
    %225 = arith.divf %223, %224 : vector<32x1xf32>
    %cst_65 = arith.constant 9.99999996E-13 : f32
    %226 = vector.broadcast %cst_65 : f32 to vector<32x1xf32>
    %227 = arith.addf %225, %226 : vector<32x1xf32>
    %228 = math.rsqrt %227 : vector<32x1xf32>
    %229 = vector.broadcast %228 : vector<32x1xf32> to vector<32x32xf32>
    %230 = arith.mulf %220, %229 : vector<32x32xf32>
    %231 = vector.extract_strided_slice %213 {offsets = [0, 0], sizes = [1, 32], strides = [1, 1]} : vector<1x128xf32> to vector<1x32xf32>
    %232 = vector.broadcast %231 : vector<1x32xf32> to vector<32x32xf32>
    %233 = arith.mulf %230, %232 : vector<32x32xf32>
    %234 = vector.extract_strided_slice %214 {offsets = [0, 0], sizes = [1, 32], strides = [1, 1]} : vector<1x128xf32> to vector<1x32xf32>
    %235 = vector.broadcast %234 : vector<1x32xf32> to vector<32x32xf32>
    %236 = arith.addf %233, %235 : vector<32x32xf32>
    %c1_66 = arith.constant 1 : index
    %c0_67 = arith.constant 0 : index
    %c0_68 = arith.constant 0 : index
    %237 = vector.load %arg6[%c1_66, %c0_67, %c0_68] : memref<2x32x64xf32, #tpu.memory_space<vmem>>, vector<1x32x64xf32>
    %238 = vector.shape_cast %237 : vector<1x32x64xf32> to vector<32x64xf32>
    %cst_69 = arith.constant dense<0.000000e+00> : vector<32x64xf32>
    %239 = tpu.matmul %236, %238, %cst_69 {dimension_numbers = #tpu.dot_dimension_numbers<[1], [0], [0], [1], [0, 0, 1, 1], [], []>} : vector<32x32xf32>, vector<32x64xf32>, vector<32x64xf32> -> vector<32x64xf32>
    %240 = vector.extract_strided_slice %1 {offsets = [22, 0], sizes = [1, 64], strides = [1, 1]} : vector<28x128xf32> to vector<1x64xf32>
    %241 = vector.broadcast %240 : vector<1x64xf32> to vector<32x64xf32>
    %242 = arith.addf %239, %241 : vector<32x64xf32>
    %cst_70 = arith.constant 5.000000e-01 : f32
    %243 = vector.broadcast %cst_70 : f32 to vector<32x64xf32>
    %244 = arith.mulf %243, %242 : vector<32x64xf32>
    %cst_71 = arith.constant 4.471500e-02 : f32
    %245 = vector.broadcast %cst_71 : f32 to vector<32x64xf32>
    %246 = arith.mulf %245, %242 : vector<32x64xf32>
    %247 = arith.mulf %246, %242 : vector<32x64xf32>
    %248 = arith.mulf %247, %242 : vector<32x64xf32>
    %249 = arith.addf %242, %248 : vector<32x64xf32>
    %cst_72 = arith.constant 0.797884583 : f32
    %250 = vector.broadcast %cst_72 : f32 to vector<32x64xf32>
    %251 = arith.mulf %250, %249 : vector<32x64xf32>
    %252 = math.tanh %251 : vector<32x64xf32>
    %cst_73 = arith.constant 1.000000e+00 : f32
    %253 = vector.broadcast %cst_73 : f32 to vector<32x64xf32>
    %254 = arith.addf %253, %252 : vector<32x64xf32>
    %255 = arith.mulf %244, %254 : vector<32x64xf32>
    %c1_74 = arith.constant 1 : index
    %c0_75 = arith.constant 0 : index
    %c0_76 = arith.constant 0 : index
    %256 = vector.load %arg7[%c1_74, %c0_75, %c0_76] : memref<2x64x32xf32, #tpu.memory_space<vmem>>, vector<1x64x32xf32>
    %257 = vector.shape_cast %256 : vector<1x64x32xf32> to vector<64x32xf32>
    %cst_77 = arith.constant dense<0.000000e+00> : vector<32x32xf32>
    %258 = tpu.matmul %255, %257, %cst_77 {dimension_numbers = #tpu.dot_dimension_numbers<[1], [0], [0], [1], [0, 0, 1, 1], [], []>} : vector<32x64xf32>, vector<64x32xf32>, vector<32x32xf32> -> vector<32x32xf32>
    %259 = vector.extract_strided_slice %1 {offsets = [23, 0], sizes = [1, 32], strides = [1, 1]} : vector<28x128xf32> to vector<1x32xf32>
    %260 = vector.broadcast %259 : vector<1x32xf32> to vector<32x32xf32>
    %261 = arith.addf %258, %260 : vector<32x32xf32>
    %262 = arith.addf %236, %261 : vector<32x32xf32>
    %263 = vector.extract_strided_slice %1 {offsets = [26, 0], sizes = [1, 128], strides = [1, 1]} : vector<28x128xf32> to vector<1x128xf32>
    %264 = vector.extract_strided_slice %1 {offsets = [27, 0], sizes = [1, 128], strides = [1, 1]} : vector<28x128xf32> to vector<1x128xf32>
    %cst_78 = arith.constant dense<0.000000e+00> : vector<32xf32>
    %265 = vector.multi_reduction <add>, %262, %cst_78 [1] : vector<32x32xf32> to vector<32xf32>
    %266 = vector.shape_cast %265 : vector<32xf32> to vector<32x1xf32>
    %cst_79 = arith.constant 3.200000e+01 : f32
    %267 = vector.broadcast %cst_79 : f32 to vector<32x1xf32>
    %268 = arith.divf %266, %267 : vector<32x1xf32>
    %269 = vector.broadcast %268 : vector<32x1xf32> to vector<32x32xf32>
    %270 = arith.subf %262, %269 : vector<32x32xf32>
    %271 = arith.mulf %270, %270 : vector<32x32xf32>
    %cst_80 = arith.constant dense<0.000000e+00> : vector<32xf32>
    %272 = vector.multi_reduction <add>, %271, %cst_80 [1] : vector<32x32xf32> to vector<32xf32>
    %273 = vector.shape_cast %272 : vector<32xf32> to vector<32x1xf32>
    %cst_81 = arith.constant 3.200000e+01 : f32
    %274 = vector.broadcast %cst_81 : f32 to vector<32x1xf32>
    %275 = arith.divf %273, %274 : vector<32x1xf32>
    %cst_82 = arith.constant 9.99999996E-13 : f32
    %276 = vector.broadcast %cst_82 : f32 to vector<32x1xf32>
    %277 = arith.addf %275, %276 : vector<32x1xf32>
    %278 = math.rsqrt %277 : vector<32x1xf32>
    %279 = vector.broadcast %278 : vector<32x1xf32> to vector<32x32xf32>
    %280 = arith.mulf %270, %279 : vector<32x32xf32>
    %281 = vector.extract_strided_slice %263 {offsets = [0, 0], sizes = [1, 32], strides = [1, 1]} : vector<1x128xf32> to vector<1x32xf32>
    %282 = vector.broadcast %281 : vector<1x32xf32> to vector<32x32xf32>
    %283 = arith.mulf %280, %282 : vector<32x32xf32>
    %284 = vector.extract_strided_slice %264 {offsets = [0, 0], sizes = [1, 32], strides = [1, 1]} : vector<1x128xf32> to vector<1x32xf32>
    %285 = vector.broadcast %284 : vector<1x32xf32> to vector<32x32xf32>
    %286 = arith.addf %283, %285 : vector<32x32xf32>
    %cst_83 = arith.constant dense<0.000000e+00> : vector<4x32xf32>
    %287 = tpu.matmul %5, %286, %cst_83 {dimension_numbers = #tpu.dot_dimension_numbers<[1], [0], [0], [1], [0, 0, 1, 1], [], []>} : vector<4x32xf32>, vector<32x32xf32>, vector<4x32xf32> -> vector<4x32xf32>
    %288 = arith.mulf %287, %287 : vector<4x32xf32>
    %cst_84 = arith.constant dense<0.000000e+00> : vector<4xf32>
    %289 = vector.multi_reduction <add>, %288, %cst_84 [1] : vector<4x32xf32> to vector<4xf32>
    %290 = vector.shape_cast %289 : vector<4xf32> to vector<4x1xf32>
    %cst_85 = arith.constant 1.000000e-24 : f32
    %291 = vector.broadcast %cst_85 : f32 to vector<4x1xf32>
    %292 = arith.maximumf %290, %291 : vector<4x1xf32>
    %293 = math.rsqrt %292 : vector<4x1xf32>
    %294 = vector.broadcast %293 : vector<4x1xf32> to vector<4x32xf32>
    %295 = arith.mulf %287, %294 : vector<4x32xf32>
    %cst_86 = arith.constant 0.000000e+00 : f32
    %296 = vector.broadcast %cst_86 : f32 to vector<4x96xf32>
    %297 = tpu.concatenate %295, %296 in 1 : vector<4x32xf32>, vector<4x96xf32> -> vector<4x128xf32>
    %c0_87 = arith.constant 0 : index
    %c0_88 = arith.constant 0 : index
    %c0_89 = arith.constant 0 : index
    %298 = vector.load %arg9[%c0_87, %c0_88, %c0_89] : memref<1x4x128xf32, #tpu.memory_space<vmem>>, vector<1x4x128xf32>
    %299 = vector.shape_cast %298 : vector<1x4x128xf32> to vector<4x128xf32>
    %300 = vector.shape_cast %297 : vector<4x128xf32> to vector<1x4x128xf32>
    tpu.vector_store %arg9[%c0_87, %c0_88, %c0_89], %300 {strides = array<i32>} : memref<1x4x128xf32, #tpu.memory_space<vmem>>, vector<1x4x128xf32>,
    return
  }
  func.func @transform_0(%arg0: i32) -> (i32, i32) {
    %c0_i32 = arith.constant 0 : i32
    %c0_i32_0 = arith.constant 0 : i32
    return %arg0, %c0_i32 : i32, i32
  }
  func.func @transform_1(%arg0: i32) -> (i32, i32, i32) {
    %c0_i32 = arith.constant 0 : i32
    %c0_i32_0 = arith.constant 0 : i32
    %c0_i32_1 = arith.constant 0 : i32
    return %arg0, %c0_i32, %c0_i32_0 : i32, i32, i32
  }
  func.func @transform_2(%arg0: i32) -> (i32, i32, i32) {
    %c0_i32 = arith.constant 0 : i32
    %c0_i32_0 = arith.constant 0 : i32
    %c0_i32_1 = arith.constant 0 : i32
    return %arg0, %c0_i32, %c0_i32_0 : i32, i32, i32
  }
  func.func @transform_3(%arg0: i32) -> (i32, i32, i32) {
    %c0_i32 = arith.constant 0 : i32
    %c0_i32_0 = arith.constant 0 : i32
    %c0_i32_1 = arith.constant 0 : i32
    return %arg0, %c0_i32, %c0_i32_0 : i32, i32, i32
  }
  func.func @transform_4(%arg0: i32) -> (i32, i32, i32) {
    %c0_i32 = arith.constant 0 : i32
    %c0_i32_0 = arith.constant 0 : i32
    %c0_i32_1 = arith.constant 0 : i32
    return %arg0, %c0_i32, %c0_i32_0 : i32, i32, i32
  }
  func.func @transform_5(%arg0: i32) -> (i32, i32, i32) {
    %c0_i32 = arith.constant 0 : i32
    %c0_i32_0 = arith.constant 0 : i32
    %c0_i32_1 = arith.constant 0 : i32
    return %arg0, %c0_i32, %c0_i32_0 : i32, i32, i32
  }
  func.func @transform_6(%arg0: i32) -> (i32, i32, i32) {
    %c0_i32 = arith.constant 0 : i32
    %c0_i32_0 = arith.constant 0 : i32
    %c0_i32_1 = arith.constant 0 : i32
    return %arg0, %c0_i32, %c0_i32_0 : i32, i32, i32
  }
  func.func @transform_7(%arg0: i32) -> (i32, i32, i32) {
    %c0_i32 = arith.constant 0 : i32
    %c0_i32_0 = arith.constant 0 : i32
    %c0_i32_1 = arith.constant 0 : i32
    return %arg0, %c0_i32, %c0_i32_0 : i32, i32, i32
  }
  func.func @transform_8(%arg0: i32) -> (i32, i32, i32) {
    %c0_i32 = arith.constant 0 : i32
    %c0_i32_0 = arith.constant 0 : i32
    %c0_i32_1 = arith.constant 0 : i32
    return %arg0, %c0_i32, %c0_i32_0 : i32, i32, i32
  }
}

</mosaic_0001>

<bundles_post_ra>
// kernel: custom_bert_forward.1
= control target key start
LH: loop header
LB: loop body
LE: loop exit
PB: predicated region body
PF: predicated region fallthrough
CT: control target
= control target key end

     0   :  { %s4159_s27 = smov 0   ;;  %s4806_s0 = inlined_call_operand.vmem [shape: f32[64,32], index: 0, kind: input, shape index: {}]   ;;  %s4807_s1 = inlined_call_operand.vmem [shape: f32[2,64,64], index: 1, kind: input, shape index: {}]   ;;  %s4808_s2 = inlined_call_operand.vmem [shape: f32[2,4,32], index: 2, kind: input, shape index: {}]   ;;  %s4809_s3 = inlined_call_operand.vmem [shape: f32[4,32,768], index: 3, kind: input, shape index: {}]   ;;  %s4810_s4 = inlined_call_operand.vmem [shape: f32[4,256,32], index: 4, kind: input, shape index: {}]   ;;  %s4811_s5 = inlined_call_operand.vmem [shape: f32[4,32,64], index: 5, kind: input, shape index: {}]   ;;  %s4812_s6 = inlined_call_operand.vmem [shape: f32[4,64,32], index: 6, kind: input, shape index: {}]   ;;  %s4813_s7 = inlined_call_operand.vmem [shape: f32[2,28,128], index: 7, kind: input, shape index: {}]   ;;  %s4814_s8 = inlined_call_operand.vmem [shape: f32[2,4,128], index: 8, kind: output, shape index: {}]  }
   0x1 LB: > { %s4165_s28 = sadd.s32 4294967295, %s4109_s27   ;;  %p3187_p0 = scmp.ge.s32.totalorder %s4109_s27, 1  ;;  %s4109_s27 = sphi %s4159_s27, %s18_s27  }
   0x2   : > { %p340_p1 = scmp.lt.s32.totalorder %s4109_s27, 3 }
   0x4   : > { %p341_p2 = pnand %p3187_p0, %p340_p1 }
   0x5   : > { %s3188_s29 = sshll.u32 (!%p341_p2), %s4165_s28, 2  ;;  %vm480_vm0 = vcmask (!%p341_p2), 261120   ;;  %s3193_s12 = sshll.u32 (!%p341_p2), %s4165_s28, 1  ;;  %v4111_v40 = vmov (!%p341_p2), 0.0   ;;  %v534_v58 = vlaneseq (!%p341_p2)  ;;  %vm1022_vm1 = vcmask (!%p341_p2), 523264  }
   0x6   : > { %344 = sbr.rel (%p341_p2) target bundleno = 5345 (0x14e1), region = 52  ;;  %p412_p3 = scmp.lt.s32.totalorder (!%p341_p2), %s3188_s29, 7  ;;  %650 = vmatprep.mubr.f32.mxu0 (!%p341_p2), %v4111_v40  ;;  %739 = vmatprep.mubr.f32.mxu1 (!%p341_p2), %v4111_v40  ;;  %vm4113_vm2 = vmmov (!%p341_p2), 0   ;;  %vm3037_vm3 = vcmask (!%p341_p2), 257024  }
   0x7   : > { %p427_p4 = scmp.lt.s32.totalorder (!%p341_p2), %s3193_s12, 3  ;;  %p417_p5 = scmp.lt.s32.totalorder (!%p341_p2), %s4165_s28, 1 }
   0xd   : > { %s4816_s29 = smov (!%p412_p3, %s3188_s29), 7  ;;  %s4818_s12 = smov (!%p427_p4, %s3193_s12), 3 }
   0xe   : > { %s3189_s30 = sshll.u32 %s4816_s29, 3  ;;  %s3961_s13 = smul.u32 192, %s4818_s12 }
   0xf   : > { %s415_s11 = scalar_lea.vmem %s4806_s0, %s3189_s30  ;;  %s4820_s28 = smov (!%p417_p5, %s4165_s28), 1 }
  0x10   : > { %v476_v0 = vld [vmem:[%s415_s11] sm:$0xff]  ;;  %v478_v1 = vld [vmem:[%s415_s11 + $0x10] sm:$0xff]  ;;  %v477_v2 = vld [vmem:[%s415_s11 + $0x8] sm:$0xff]  ;;  %s4204_s16 = scalar_lea.vmem %s4809_s3, %s3961_s13  ;;  %s3338_s17 = sshll.u32 %s4820_s28, 5 }
  0x11   : > { %v481_v3 = vsel %vm480_vm0, %v476_v0, 0.0  ;;  %v487_v4 = vsel %vm480_vm0, %v478_v1, 0.0  ;;  %v479_v5 = vld [vmem:[%s415_s11 + $0x18] sm:$0xff]  ;;  %v484_v6 = vsel %vm480_vm0, %v477_v2, 0.0  ;;  %v551_v28 = vld [vmem:[%s4204_s16 + $0x8] sm:$0xff]  ;;  %v550_v33 = vld [vmem:[%s4204_s16] sm:$0xff]  ;;  %s4236_s20 = scalar_lea.vmem %s4813_s7, %s3338_s17 }
  0x12   : > { %482 = vadd.xlane.f32.xlu0 %v481_v3  ;;  %488 = vadd.xlane.f32.xlu1 %v487_v4  ;;  %v490_v7 = vsel %vm480_vm0, %v479_v5, 0.0  ;;  %v557_v29 = vld [vmem:[%s4204_s16 + $0x38] sm:$0xff]  ;;  %v559_v32 = vld [vmem:[%s4204_s16 + $0x48] sm:$0xff]  ;;  %v556_v34 = vld [vmem:[%s4204_s16 + $0x30] sm:$0xff]  ;;  %s3334_s21 = sshll.u32 %s4820_s28, 6  ;;  %s3335_s25 = sshll.u32 %s4818_s12, 8 }
  0x13   : > { %v553_v30 = vld [vmem:[%s4204_s16 + $0x18] sm:$0xff]  ;;  %v3731_v31 = vpack.c.bf16 %v557_v29, %v551_v28  ;;  %v3733_v36 = vpack.c.bf16 %v556_v34, %v550_v33  ;;  %v552_v37 = vld [vmem:[%s4204_s16 + $0x10] sm:$0xff]  ;;  %v558_v38 = vld [vmem:[%s4204_s16 + $0x40] sm:$0xff]  ;;  %s4352_s24 = scalar_lea.vmem %s4807_s1, %s3334_s21  ;;  %s4394_s30 = scalar_lea.vmem %s4810_s4, %s3335_s25 }
  0x14   : > { %v3739_v35 = vpack.c.bf16 %v559_v32, %v553_v30  ;;  %v563_v39 = vld [vmem:[%s4204_s16 + $0x68] sm:$0xff]  ;;  %v3741_v41 = vpack.c.bf16 %v558_v38, %v552_v37  ;;  %v569_v42 = vld [vmem:[%s4204_s16 + $0x98] sm:$0xff]  ;;  %v562_v47 = vld [vmem:[%s4204_s16 + $0x60] sm:$0xff]  ;;  %s3336_s9 = sshll.u32 %s4818_s12, 5  ;;  %s3337_s14 = sshll.u32 %s4818_s12, 6 }
  0x15   : > { %3732 = vmatprep.subr.bf16.mxu0 %v3731_v31  ;;  %v565_v43 = vld [vmem:[%s4204_s16 + $0x78] sm:$0xff]  ;;  %v571_v44 = vld [vmem:[%s4204_s16 + $0xa8] sm:$0xff]  ;;  %v3735_v45 = vpack.c.bf16 %v569_v42, %v563_v39  ;;  %v568_v48 = vld [vmem:[%s4204_s16 + $0x90] sm:$0xff]  ;;  %s4462_s13 = scalar_lea.vmem %s4811_s5, %s3336_s9  ;;  %s4492_s18 = scalar_lea.vmem %s4812_s6, %s3337_s14 }
  0x16   : > { %485 = vadd.xlane.f32.xlu0 %v484_v6  ;;  %491 = vadd.xlane.f32.xlu1 %v490_v7  ;;  %v3743_v46 = vpack.c.bf16 %v571_v44, %v565_v43  ;;  %v564_v49 = vld [vmem:[%s4204_s16 + $0x70] sm:$0xff]  ;;  %v3737_v50 = vpack.c.bf16 %v568_v48, %v562_v47  ;;  %v570_v51 = vld [vmem:[%s4204_s16 + $0xa0] sm:$0xff]  ;;  %v555_v53 = vld [vmem:[%s4204_s16 + $0x28] sm:$0xff]  ;;  %s3192_s12 = sshll.u32 %s4820_s28, 2 }
  0x17   : > { %3740 = vmatprep.subr.bf16.mxu1 %v3739_v35  ;;  %3734 = vmatpush1.bf16.msra.mxu0 %v3733_v36  ;;  %v3745_v52 = vpack.c.bf16 %v570_v51, %v564_v49  ;;  %v561_v54 = vld [vmem:[%s4204_s16 + $0x58] sm:$0xff]  ;;  %v4242_v7 = vld [vmem:[%s4236_s20] sm:$0xff]  ;;  %v572_v29 = vld [vmem:[%s4204_s16 + $0xb0] sm:$0xff]  ;;  %s462_s22 = scalar_lea.vmem %s4814_s8, %s3192_s12 }
  0x18   : > { %3742 = vmatpush1.bf16.msra.mxu1 %v3741_v41  ;;  %3736 = vmatprep.subr.bf16.mxu0 %v3735_v45  ;;  %v3747_v55 = vpack.c.bf16 %v561_v54, %v555_v53  ;;  %v566_v28 = vld [vmem:[%s4204_s16 + $0x80] sm:$0xff] }
  0x19   : > { %3744 = vmatprep.subr.bf16.mxu1 %v3743_v46  ;;  %v3753_v32 = vpack.c.bf16 %v572_v29, %v566_v28 }
  0x1b   : > { %3738 = vmatpush1.bf16.msra.mxu0 %v3737_v50 }
  0x1c   : > { %3746 = vmatpush1.bf16.msra.mxu1 %v3745_v52  ;;  %3748 = vmatprep.subr.bf16.mxu0 %v3747_v55 }
  0x9f   : > { %v483_v8 = vpop.xlane.xlu0 %482  ;;  %v489_v9 = vpop.xlane.xlu1 %488 }
  0xa0   : > { %v494_v10 = vmul.f32 0.03125, %v483_v8  ;;  %v496_v11 = vmul.f32 0.03125, %v489_v9 }
  0xa2   : > { %v4177_v12 = vsub.f32 %v476_v0, %v494_v10  ;;  %v4179_v13 = vsub.f32 %v478_v1, %v496_v11  ;;  %v4231_v0 = vshrl.u32 %v534_v58, 7 }
  0xa3   : > { %v486_v14 = vpop.xlane.xlu0 %485  ;;  %v492_v15 = vpop.xlane.xlu1 %491 }
  0xa4   : > { %v495_v16 = vmul.f32 0.03125, %v486_v14  ;;  %v497_v17 = vmul.f32 0.03125, %v492_v15  ;;  %v502_v18 = vmul.f32 %v4177_v12, %v4177_v12  ;;  %v504_v19 = vmul.f32 %v4179_v13, %v4179_v13  ;;  %v554_v15 = vld [vmem:[%s4204_s16 + $0x20] sm:$0xff] }
  0xa5   : > { %v4245_v8 = vsub.s32 1, %v4231_v0  ;;  %v4304_v36 = vsub.s32 2, %v4231_v0  ;;  %v4311_v38 = vsub.s32 4, %v4231_v0  ;;  %v4314_v39 = vsub.s32 3, %v4231_v0 }
  0xa6   : > { %v4185_v20 = vsub.f32 %v477_v2, %v495_v16  ;;  %v4187_v21 = vsub.f32 %v479_v5, %v497_v17  ;;  %v506_v22 = vsel %vm480_vm0, %v502_v18, 0.0  ;;  %v512_v23 = vsel %vm480_vm0, %v504_v19, 0.0  ;;  %v560_v16 = vld [vmem:[%s4204_s16 + $0x50] sm:$0xff]  ;;  %v567_v17 = vld [vmem:[%s4204_s16 + $0x88] sm:$0xff]  ;;  %v573_v18 = vld [vmem:[%s4204_s16 + $0xb8] sm:$0xff] }
  0xa7   : > { %507 = vadd.xlane.f32.xlu0 %v506_v22  ;;  %v4239_v5 = vsub.s32 0, %v4231_v0  ;;  %v545_v14 = vrot.slane %v4242_v7, %v4245_v8  ;;  %v4308_v37 = vrot.slane %v4242_v7, %v4304_v36  ;;  %v888_v44 = vrot.slane %v4242_v7, %v4311_v38 }
  0xa8   : > { %v503_v24 = vmul.f32 %v4185_v20, %v4185_v20  ;;  %v505_v25 = vmul.f32 %v4187_v21, %v4187_v21  ;;  %v872_v47 = vrot.slane %v4242_v7, %v4314_v39 }
  0xa9   : > { %v537_v9 = vrot.slane %v4242_v7, %v4239_v5 }
  0xaa   : > { %v509_v26 = vsel %vm480_vm0, %v503_v24, 0.0  ;;  %v515_v27 = vsel %vm480_vm0, %v505_v25, 0.0 }
  0xab   : > { %513 = vadd.xlane.f32.xlu0 %v512_v23  ;;  %510 = vadd.xlane.f32.xlu1 %v509_v26  ;;  %v3749_v23 = vpack.c.bf16 %v560_v16, %v554_v15 }
  0xaf   : > { %516 = vadd.xlane.f32.xlu1 %v515_v27  ;;  %v3751_v27 = vpack.c.bf16 %v573_v18, %v567_v17 }
 0x134   : > { %v508_v56 = vpop.xlane.xlu0 %507 }
 0x135   : > { %v518_v57 = vmul.f32 0.03125, %v508_v56 }
 0x137   : > { %v522_v59 = vadd.f32 1e-12, %v518_v57 }
 0x138   : > { %v511_v60 = vpop.xlane.xlu1 %510  ;;  %v514_v61 = vpop.xlane.xlu0 %513 }
 0x139   : > { %3973 = vrsqrt.f32 %v522_v59  ;;  %v519_v62 = vmul.f32 0.03125, %v511_v60  ;;  %v520_v63 = vmul.f32 0.03125, %v514_v61 }
 0x13b   : > { %v523_v1 = vadd.f32 1e-12, %v519_v62  ;;  %v524_v2 = vadd.f32 1e-12, %v520_v63 }
 0x13c   : > { %v517_v3 = vpop.xlane.xlu1 %516 }
 0x13d   : > { %3975 = vrsqrt.f32 %v523_v1  ;;  %v521_v4 = vmul.f32 0.03125, %v517_v3 }
 0x13e   : > { %3977 = vrsqrt.f32 %v524_v2 }
 0x13f   : > { %v525_v6 = vadd.f32 1e-12, %v521_v4 }
 0x141   : > { %3979 = vrsqrt.f32 %v525_v6  ;;  %v4328_v6 = vsub.s32 6, %v4231_v0 }
 0x143   : > { %v3974_v10 = vpop.eup %3973  ;;  %v880_v17 = vrot.slane %v4242_v7, %v4328_v6 }
 0x144   : > { %v530_v11 = vmul.f32 %v3974_v10, %v4177_v12 }
 0x146   : > { %v538_v19 = vmul.f32 %v537_v9, %v530_v11  ;;  %v4331_v11 = vsub.s32 7, %v4231_v0 }
 0x147   : > { %v3976_v22 = vpop.eup %3975 }
 0x148   : > { %v3978_v24 = vpop.eup %3977  ;;  %v4256_v25 = vadd.f32 %v545_v14, %v538_v19  ;;  %v531_v26 = vmul.f32 %v3976_v22, %v4185_v20  ;;  %v896_v19 = vrot.slane %v4242_v7, %v4331_v11 }
 0x149   : > { %v532_v12 = vmul.f32 %v3978_v24, %v4179_v13 }
 0x14a   : > { %3207 = vmatmul.mubr.msk.f32.vlgmr.msra.gmra.mrb[0].mxu0 %vm480_vm0, %v4256_v25  ;;  %3211 = vmatmul.mubr.msk.f32.vlgmr.msra.gmra.mrb[0].mxu1 %vm480_vm0, %v4256_v25  ;;  %v539_v30 = vmul.f32 %v537_v9, %v531_v26 }
 0x14b   : > { %v3980_v31 = vpop.eup %3979  ;;  %3750 = vmatpush1.bf16.msra.mxu0 %v3749_v23  ;;  %656 = vmatprep.mubr.f32.mxu0 %v4111_v40  ;;  %v540_v33 = vmul.f32 %v537_v9, %v532_v12 }
 0x14c   : > { %745 = vmatprep.mubr.f32.mxu1 %v4111_v40  ;;  %v4268_v20 = vadd.f32 %v545_v14, %v539_v30  ;;  %3752 = vmatprep.subr.bf16.mxu0 %v3751_v27  ;;  %v533_v13 = vmul.f32 %v3980_v31, %v4187_v21 }
 0x14d   : > { %v4277_v34 = vadd.f32 %v545_v14, %v540_v33 }
 0x14e   : > { %3208 = vmatmul.mubr.msk.f32.gmra.mrb[2].mxu0 %vm480_vm0, %v4268_v20  ;;  %3212 = vmatmul.mubr.msk.f32.gmra.mrb[2].mxu1 %vm480_vm0, %v4268_v20  ;;  %v541_v35 = vmul.f32 %v537_v9, %v533_v13 }
 0x14f   : > { %662 = vmatprep.mubr.f32.mxu0 %v4111_v40  ;;  %751 = vmatprep.mubr.f32.mxu1 %v4111_v40 }
 0x150   : > { %3754 = vmatpush1.bf16.msra.mxu0 %v3753_v32  ;;  %v4285_v21 = vadd.f32 %v545_v14, %v541_v35 }
 0x152   : > { %3209 = vmatmul.mubr.msk.f32.gmra.mrb[4].mxu0 %vm480_vm0, %v4277_v34  ;;  %3213 = vmatmul.mubr.msk.f32.gmra.mrb[4].mxu1 %vm480_vm0, %v4277_v34 }
 0x153   : > { %668 = vmatprep.mubr.f32.mxu0 %v4111_v40  ;;  %757 = vmatprep.mubr.f32.mxu1 %v4111_v40 }
 0x156   : > { %3210 = vmatmul.mubr.msk.f32.gmra.mrb[6].mxu0 %vm480_vm0, %v4285_v21  ;;  %3214 = vmatmul.mubr.msk.f32.gmra.mrb[6].mxu1 %vm480_vm0, %v4285_v21 }
 0x157   : > { %828 = vmatprep.mubr.f32.mxu0 %v4111_v40 }
 0x15a   : > { %3215 = vmatmul.mubr.msk.f32.vlgmr.msra.gmra.mrb[8].mxu0 %vm480_vm0, %v4256_v25 }
 0x15b   : > { %834 = vmatprep.mubr.f32.mxu0 %v4111_v40 }
 0x15e   : > { %3216 = vmatmul.mubr.msk.f32.gmra.mrb[10].mxu0 %vm480_vm0, %v4268_v20 }
 0x15f   : > { %840 = vmatprep.mubr.f32.mxu0 %v4111_v40 }
 0x162   : > { %3217 = vmatmul.mubr.msk.f32.gmra.mrb[12].mxu0 %vm480_vm0, %v4277_v34 }
 0x163   : > { %846 = vmatprep.mubr.f32.mxu0 %v4111_v40 }
 0x166   : > { %3218 = vmatmul.mubr.msk.f32.gmra.mrb[14].mxu0 %vm480_vm0, %v4285_v21 }
 0x21d   : > { %v652_v41 = vpop.f32.mrb[0].mxu0  ;;  %v741_v42 = vpop.f32.mrb[0].mxu1 }
 0x21e   : > { %v857_v43 = vadd.f32 %v4308_v37, %v652_v41  ;;  %v654_v45 = vpop.f32.mrb[1].mxu0  ;;  %v4319_v46 = vpop.f32.mrb[1].mxu1  ;;  %v889_v50 = vadd.f32 %v888_v44, %v741_v42 }
 0x21f   : > { %v873_v54 = vadd.f32 %v872_v47, %v654_v45  ;;  %v4338_v45 = vsub.s32 5, %v4231_v0 }
 0x220   : > { %3552 = vmatprep.mubr.f32.mxu1 %v857_v43 }
 0x221   : > { %v4323_v48 = vpop.f32.mrb[2].mxu0  ;;  %v747_v49 = vpop.f32.mrb[2].mxu1 }
 0x222   : > { %v890_v51 = vadd.f32 %v888_v44, %v747_v49  ;;  %v660_v52 = vpop.f32.mrb[3].mxu0  ;;  %v4325_v53 = vpop.f32.mrb[3].mxu1  ;;  %v864_v49 = vrot.slane %v4242_v7, %v4338_v45 }
 0x223   : > { %v874_v55 = vadd.f32 %v872_v47, %v660_v52 }
 0x224   : > { %v3771_v56 = vpack.c.bf16 %v890_v51, %v889_v50  ;;  %v865_v52 = vadd.f32 %v864_v49, %v4319_v46  ;;  %v866_v0 = vadd.f32 %v864_v49, %v4325_v53  ;;  %v467_v53 = vld [vmem:[%s4352_s24] sm:$0xff] }
 0x225   : > { %v3755_v57 = vpack.c.bf16 %v874_v55, %v873_v54  ;;  %v664_v58 = vpop.f32.mrb[4].mxu0  ;;  %v753_v59 = vpop.f32.mrb[4].mxu1 }
 0x226   : > { %v666_v60 = vpop.f32.mrb[5].mxu0  ;;  %v755_v61 = vpop.f32.mrb[5].mxu1  ;;  %3772 = vmatprep.subr.bf16.mxu0 %v3771_v56  ;;  %v891_v1 = vadd.f32 %v888_v44, %v753_v59  ;;  %v859_v50 = vadd.f32 %v4308_v37, %v664_v58 }
 0x227   : > { %3756 = vmatprep.subr.bf16.mxu1 %v3755_v57  ;;  %3774 = vmatpush3.bf16.msra.mxu0 %v3771_v56  ;;  %v875_v9 = vadd.f32 %v872_v47, %v666_v60  ;;  %v867_v54 = vadd.f32 %v864_v49, %v755_v61  ;;  %v470_v60 = vld [vmem:[%s4352_s24 + $0x18] sm:$0xff] }
 0x228   : > { %3758 = vmatpush3.bf16.xpose.msra.mxu1 %v3755_v57 }
 0x229   : > { %v670_v62 = vpop.f32.mrb[6].mxu0  ;;  %v759_v63 = vpop.f32.mrb[6].mxu1 }
 0x22a   : > { %v892_v2 = vadd.f32 %v888_v44, %v759_v63  ;;  %v672_v3 = vpop.f32.mrb[7].mxu0  ;;  %v761_v4 = vpop.f32.mrb[7].mxu1  ;;  %v860_v51 = vadd.f32 %v4308_v37, %v670_v62 }
 0x22b   : > { %v876_v10 = vadd.f32 %v872_v47, %v672_v3  ;;  %v858_v47 = vadd.f32 %v4308_v37, %v4323_v48  ;;  %v868_v55 = vadd.f32 %v864_v49, %v761_v4  ;;  %v468_v37 = vld [vmem:[%s4352_s24 + $0x8] sm:$0xff] }
 0x22c   : > { %v3775_v14 = vpack.c.bf16 %v892_v2, %v891_v1  ;;  %v469_v1 = vld [vmem:[%s4352_s24 + $0x10] sm:$0xff] }
 0x22d   : > { %v3759_v15 = vpack.c.bf16 %v876_v10, %v875_v9  ;;  %v830_v16 = vpop.f32.mrb[8].mxu0 }
 0x22e   : > { %v832_v18 = vpop.f32.mrb[9].mxu0  ;;  %3776 = vmatprep.subr.bf16.mxu0 %v3775_v14  ;;  %v881_v23 = vadd.f32 %v880_v17, %v830_v16 }
 0x22f   : > { %3760 = vmatprep.subr.bf16.mxu1 %v3759_v15  ;;  %3778 = vmatpush3.bf16.msra.mxu0 %v3775_v14  ;;  %v897_v27 = vadd.f32 %v896_v19, %v832_v18  ;;  %v472_v14 = vld [vmem:[%s4352_s24 + $0x28] sm:$0xff]  ;;  %v471_v18 = vld [vmem:[%s4352_s24 + $0x20] sm:$0xff] }
 0x230   : > { %3762 = vmatpush3.bf16.xpose.msra.mxu1 %v3759_v15 }
 0x231   : > { %v836_v22 = vpop.f32.mrb[10].mxu0 }
 0x232   : > { %v882_v24 = vadd.f32 %v880_v17, %v836_v22  ;;  %v838_v26 = vpop.f32.mrb[11].mxu0 }
 0x233   : > { %v898_v28 = vadd.f32 %v896_v19, %v838_v26 }
 0x234   : > { %v3763_v29 = vpack.c.bf16 %v882_v24, %v881_v23 }
 0x235   : > { %v3779_v12 = vpack.c.bf16 %v898_v28, %v897_v27  ;;  %v842_v30 = vpop.f32.mrb[12].mxu0  ;;  %v474_v27 = vld [vmem:[%s4352_s24 + $0x38] sm:$0xff] }
 0x236   : > { %v844_v31 = vpop.f32.mrb[13].mxu0  ;;  %3764 = vmatprep.subr.bf16.mxu1 %v3763_v29  ;;  %v883_v33 = vadd.f32 %v880_v17, %v842_v30  ;;  %v473_v30 = vld [vmem:[%s4352_s24 + $0x30] sm:$0xff] }
 0x237   : > { %3780 = vmatprep.subr.bf16.mxu0 %v3779_v12  ;;  %v899_v41 = vadd.f32 %v896_v19, %v844_v31 }
 0x238   : > { %3766 = vmatpush3.bf16.xpose.msra.mxu1 %v3763_v29  ;;  %3782 = vmatpush3.bf16.msra.mxu0 %v3779_v12 }
 0x239   : > { %v848_v32 = vpop.f32.mrb[14].mxu0 }
 0x23a   : > { %v884_v13 = vadd.f32 %v880_v17, %v848_v32  ;;  %v850_v35 = vpop.f32.mrb[15].mxu0 }
 0x23b   : > { %v900_v42 = vadd.f32 %v896_v19, %v850_v35 }
 0x23c   : > { %v3767_v43 = vpack.c.bf16 %v884_v13, %v883_v33 }
 0x23d   : > { %v3783_v44 = vpack.c.bf16 %v900_v42, %v899_v41 }
 0x23e   : > { %3768 = vmatprep.subr.bf16.mxu1 %v3767_v43 }
 0x23f   : > { %3784 = vmatprep.subr.bf16.mxu0 %v3783_v44 }
 0x240   : > { %3770 = vmatpush3.bf16.xpose.msra.mxu1 %v3767_v43  ;;  %3786 = vmatpush3.bf16.msra.mxu0 %v3783_v44 }
 0x247   : > { %3553 = vmatmul.mubr.f32.vlgmr.msra.gmra.mrb[8].mxu1 %v858_v47 }
 0x248   : > { %3555 = vmatprep.mubr.f32.mxu1 %v859_v50 }
 0x24b   : > { %3556 = vmatmul.mubr.f32.gmra.mrb[10].mxu1 %v860_v51 }
 0x24c   : > { %3558 = vmatprep.mubr.f32.mxu1 %v865_v52 }
 0x24f   : > { %3559 = vmatmul.mubr.f32.gmra.mrb[12].mxu1 %v866_v0 }
 0x250   : > { %3561 = vmatprep.mubr.f32.mxu1 %v867_v54 }
 0x253   : > { %3562 = vmatmul.mubr.f32.gmra.mrb[14].mxu1 %v868_v55 }
 0x31a   : > { %v3554_v7 = vpop.f32.mrb[8].mxu1 }
 0x31b   : > { %v1007_v46 = vmul.f32 0.25, %v3554_v7  ;;  %v967_v48 = vpop.f32.mrb[9].mxu1 }
 0x31c   : > { %v1006_v56 = vmul.f32 0.25, %v967_v48 }
 0x31d   : > { %v1015_v57 = vadd.f32 %v1007_v46, %v468_v37 }
 0x31e   : > { %v3557_v58 = vpop.f32.mrb[10].mxu1  ;;  %v1014_v59 = vadd.f32 %v1006_v56, %v467_v53 }
 0x31f   : > { %v1009_v61 = vmul.f32 0.25, %v3557_v58  ;;  %v977_v62 = vpop.f32.mrb[11].mxu1  ;;  %v1026_v63 = vsel %vm1022_vm1, %v1015_v57, -inf }
 0x320   : > { %v1008_v2 = vmul.f32 0.25, %v977_v62  ;;  %1027 = vmax.xlane.f32.xlu1 %v1026_v63  ;;  %v1023_v3 = vsel %vm1022_vm1, %v1014_v59, -inf }
 0x321   : > { %1024 = vmax.xlane.f32.xlu0 %v1023_v3  ;;  %v1017_v4 = vadd.f32 %v1009_v61, %v470_v60 }
 0x322   : > { %v3560_v9 = vpop.f32.mrb[12].mxu1  ;;  %v1016_v10 = vadd.f32 %v1008_v2, %v469_v1 }
 0x323   : > { %v1011_v15 = vmul.f32 0.25, %v3560_v9  ;;  %v987_v16 = vpop.f32.mrb[13].mxu1  ;;  %v1032_v17 = vsel %vm1022_vm1, %v1017_v4, -inf }
 0x324   : > { %v1010_v19 = vmul.f32 0.25, %v987_v16  ;;  %1033 = vmax.xlane.f32.xlu1 %v1032_v17  ;;  %v1029_v22 = vsel %vm1022_vm1, %v1016_v10, -inf }
 0x325   : > { %1030 = vmax.xlane.f32.xlu0 %v1029_v22  ;;  %v1019_v23 = vadd.f32 %v1011_v15, %v472_v14 }
 0x326   : > { %v3563_v24 = vpop.f32.mrb[14].mxu1  ;;  %v1018_v26 = vadd.f32 %v1010_v19, %v471_v18 }
 0x327   : > { %v1013_v28 = vmul.f32 0.25, %v3563_v24  ;;  %v997_v29 = vpop.f32.mrb[15].mxu1  ;;  %v1038_v12 = vsel %vm1022_vm1, %v1019_v23, -inf }
 0x328   : > { %v1012_v31 = vmul.f32 0.25, %v997_v29  ;;  %1039 = vmax.xlane.f32.xlu1 %v1038_v12  ;;  %v1035_v32 = vsel %vm1022_vm1, %v1018_v26, -inf }
 0x329   : > { %1036 = vmax.xlane.f32.xlu0 %v1035_v32  ;;  %v1021_v33 = vadd.f32 %v1013_v28, %v474_v27  ;;  %v1256_v27 = vld [vmem:[%s4394_s30 + $0x80] sm:$0xff]  ;;  %v1257_v28 = vld [vmem:[%s4394_s30 + $0x88] sm:$0xff] }
 0x32a   : > { %v1020_v13 = vadd.f32 %v1012_v31, %v473_v30  ;;  %v3787_v29 = vpack.c.bf16 %v1257_v28, %v1256_v27 }
 0x32b   : > { %v1044_v35 = vsel %vm1022_vm1, %v1021_v33, -inf }
 0x32c   : > { %1045 = vmax.xlane.f32.xlu1 %v1044_v35  ;;  %v1041_v41 = vsel %vm1022_vm1, %v1020_v13, -inf  ;;  %3788 = vmatprep.subr.bf16.mxu0 %v3787_v29  ;;  %v1240_v35 = vld [vmem:[%s4394_s30] sm:$0xff] }
 0x32d   : > { %1042 = vmax.xlane.f32.xlu0 %v1041_v41  ;;  %v1241_v41 = vld [vmem:[%s4394_s30 + $0x8] sm:$0xff]  ;;  %v1248_v29 = vld [vmem:[%s4394_s30 + $0x40] sm:$0xff] }
 0x3ad   : > { %v1028_v42 = vpop.xlane.xlu1 %1027 }
 0x3ae   : > { %v1048_v43 = vsub.f32 %v1015_v57, %v1028_v42  ;;  %v1025_v44 = vpop.xlane.xlu0 %1024 }
 0x3af   : > { %v1047_v47 = vsub.f32 %v1014_v59, %v1025_v44  ;;  %v1259_v44 = vld [vmem:[%s4394_s30 + $0x98] sm:$0xff] }
 0x3b0   : > { %v1057_v49 = vmul.f32 1.442695, %v1048_v43  ;;  %v1258_v43 = vld [vmem:[%s4394_s30 + $0x90] sm:$0xff] }
 0x3b1   : > { %v1055_v50 = vmul.f32 1.442695, %v1047_v47  ;;  %v1034_v51 = vpop.xlane.xlu1 %1033 }
 0x3b2   : > { %3981 = vpow2.f32 %v1057_v49  ;;  %v1050_v52 = vsub.f32 %v1017_v4, %v1034_v51  ;;  %v1031_v0 = vpop.xlane.xlu0 %1030 }
 0x3b3   : > { %3983 = vpow2.f32 %v1055_v50  ;;  %v1049_v54 = vsub.f32 %v1016_v10, %v1031_v0 }
 0x3b4   : > { %v1061_v55 = vmul.f32 1.442695, %v1050_v52  ;;  %v3789_v52 = vpack.c.bf16 %v1241_v41, %v1240_v35  ;;  %v1268_v35 = vld [vmem:[%s4394_s30 + $0xe0] sm:$0xff]  ;;  %v1269_v41 = vld [vmem:[%s4394_s30 + $0xe8] sm:$0xff] }
 0x3b5   : > { %v1059_v7 = vmul.f32 1.442695, %v1049_v54  ;;  %v1040_v37 = vpop.xlane.xlu1 %1039  ;;  %v3791_v54 = vpack.c.bf16 %v1259_v44, %v1258_v43  ;;  %v1252_v43 = vld [vmem:[%s4394_s30 + $0x60] sm:$0xff]  ;;  %v1253_v44 = vld [vmem:[%s4394_s30 + $0x68] sm:$0xff] }
 0x3b6   : > { %3985 = vpow2.f32 %v1061_v55  ;;  %v1052_v46 = vsub.f32 %v1019_v23, %v1040_v37  ;;  %v1037_v48 = vpop.xlane.xlu0 %1036  ;;  %v1242_v55 = vld [vmem:[%s4394_s30 + $0x10] sm:$0xff] }
 0x3b7   : > { %3987 = vpow2.f32 %v1059_v7  ;;  %v1051_v53 = vsub.f32 %v1018_v26, %v1037_v48  ;;  %v1243_v7 = vld [vmem:[%s4394_s30 + $0x18] sm:$0xff]  ;;  %v1261_v48 = vld [vmem:[%s4394_s30 + $0xa8] sm:$0xff] }
 0x3b8   : > { %v1065_v56 = vmul.f32 1.442695, %v1052_v46  ;;  %v1260_v46 = vld [vmem:[%s4394_s30 + $0xa0] sm:$0xff] }
 0x3b9   : > { %v1063_v57 = vmul.f32 1.442695, %v1051_v53  ;;  %v1046_v58 = vpop.xlane.xlu1 %1045 }
 0x3ba   : > { %3989 = vpow2.f32 %v1065_v56  ;;  %v1054_v59 = vsub.f32 %v1021_v33, %v1046_v58  ;;  %v1043_v60 = vpop.xlane.xlu0 %1042 }
 0x3bb   : > { %3991 = vpow2.f32 %v1063_v57  ;;  %v1053_v61 = vsub.f32 %v1020_v13, %v1043_v60  ;;  %v3793_v57 = vpack.c.bf16 %v1243_v7, %v1242_v55  ;;  %v1244_v60 = vld [vmem:[%s4394_s30 + $0x20] sm:$0xff] }
 0x3bc   : > { %v3982_v62 = vpop.eup %3981  ;;  %v1069_v63 = vmul.f32 1.442695, %v1054_v59  ;;  %v3795_v59 = vpack.c.bf16 %v1261_v48, %v1260_v46 }
 0x3bd   : > { %v3984_v1 = vpop.eup %3983  ;;  %v1067_v2 = vmul.f32 1.442695, %v1053_v61  ;;  %v1074_v3 = vsel %vm1022_vm1, %v3982_v62, 0.0  ;;  %v1245_v61 = vld [vmem:[%s4394_s30 + $0x28] sm:$0xff] }
 0x3be   : > { %3993 = vpow2.f32 %v1069_v63  ;;  %1075 = vadd.xlane.f32.xlu1 %v1074_v3  ;;  %v1071_v4 = vsel %vm1022_vm1, %v3984_v1, 0.0  ;;  %v1262_v63 = vld [vmem:[%s4394_s30 + $0xb0] sm:$0xff] }
 0x3bf   : > { %3995 = vpow2.f32 %v1067_v2  ;;  %1072 = vadd.xlane.f32.xlu0 %v1071_v4  ;;  %v3797_v4 = vpack.c.bf16 %v1245_v61, %v1244_v60 }
 0x3c0   : > { %v3986_v9 = vpop.eup %3985 }
 0x3c1   : > { %v3988_v10 = vpop.eup %3987  ;;  %v1080_v14 = vsel %vm1022_vm1, %v3986_v9, 0.0 }
 0x3c2   : > { %1081 = vadd.xlane.f32.xlu1 %v1080_v14  ;;  %v1077_v15 = vsel %vm1022_vm1, %v3988_v10, 0.0  ;;  %v1246_v14 = vld [vmem:[%s4394_s30 + $0x30] sm:$0xff] }
 0x3c3   : > { %1078 = vadd.xlane.f32.xlu0 %v1077_v15  ;;  %v1247_v15 = vld [vmem:[%s4394_s30 + $0x38] sm:$0xff] }
 0x3c4   : > { %v4374_v16 = vpop.eup %3989 }
 0x3c5   : > { %v4376_v17 = vpop.eup %3991  ;;  %v1086_v18 = vsel %vm1022_vm1, %v4374_v16, 0.0 }
 0x3c6   : > { %1087 = vadd.xlane.f32.xlu1 %v1086_v18  ;;  %v1083_v19 = vsel %vm1022_vm1, %v4376_v17, 0.0 }
 0x3c7   : > { %1084 = vadd.xlane.f32.xlu0 %v1083_v19  ;;  %v1264_v19 = vld [vmem:[%s4394_s30 + $0xc0] sm:$0xff] }
 0x3c8   : > { %v4382_v22 = vpop.eup %3993 }
 0x3c9   : > { %v4384_v23 = vpop.eup %3995  ;;  %v1092_v24 = vsel %vm1022_vm1, %v4382_v22, 0.0 }
 0x3ca   : > { %1093 = vadd.xlane.f32.xlu1 %v1092_v24  ;;  %v1089_v26 = vsel %vm1022_vm1, %v4384_v23, 0.0  ;;  %v1265_v24 = vld [vmem:[%s4394_s30 + $0xc8] sm:$0xff] }
 0x3cb   : > { %1090 = vadd.xlane.f32.xlu0 %v1089_v26  ;;  %v3803_v28 = vpack.c.bf16 %v1265_v24, %v1264_v19 }
 0x44b   : > { %v1076_v12 = vpop.xlane.xlu1 %1075 }
 0x44c   : > { %3997 = vrcp.f32 %v1076_v12  ;;  %v1073_v30 = vpop.xlane.xlu0 %1072  ;;  %v1249_v12 = vld [vmem:[%s4394_s30 + $0x48] sm:$0xff] }
 0x44d   : > { %3999 = vrcp.f32 %v1073_v30  ;;  %v1266_v30 = vld [vmem:[%s4394_s30 + $0xd0] sm:$0xff] }
 0x44f   : > { %v1082_v31 = vpop.xlane.xlu1 %1081 }
 0x450   : > { %4001 = vrcp.f32 %v1082_v31  ;;  %v1079_v32 = vpop.xlane.xlu0 %1078  ;;  %v1267_v31 = vld [vmem:[%s4394_s30 + $0xd8] sm:$0xff] }
 0x451   : > { %4003 = vrcp.f32 %v1079_v32  ;;  %v1250_v32 = vld [vmem:[%s4394_s30 + $0x50] sm:$0xff] }
 0x453   : > { %v1088_v33 = vpop.xlane.xlu1 %1087 }
 0x454   : > { %4005 = vrcp.f32 %v1088_v33  ;;  %v1085_v13 = vpop.xlane.xlu0 %1084  ;;  %v1251_v33 = vld [vmem:[%s4394_s30 + $0x58] sm:$0xff] }
 0x455   : > { %4007 = vrcp.f32 %v1085_v13  ;;  %v3809_v13 = vpack.c.bf16 %v1251_v33, %v1250_v32 }
 0x456   : > { %v3998_v42 = vpop.eup %3997 }
 0x457   : > { %v4000_v47 = vpop.eup %3999  ;;  %v1094_v49 = vpop.xlane.xlu1 %1093  ;;  %v1098_v0 = vmul.f32 %v3998_v42, %v3982_v62  ;;  %v3811_v42 = vpack.c.bf16 %v1269_v41, %v1268_v35 }
 0x458   : > { %4009 = vrcp.f32 %v1094_v49  ;;  %v1091_v50 = vpop.xlane.xlu0 %1090  ;;  %v1096_v51 = vmul.f32 %v4000_v47, %v3984_v1  ;;  %v1263_v1 = vld [vmem:[%s4394_s30 + $0xb8] sm:$0xff]  ;;  %v3813_v47 = vpack.c.bf16 %v1253_v44, %v1252_v43  ;;  %v1270_v49 = vld [vmem:[%s4394_s30 + $0xf0] sm:$0xff] }
 0x459   : > { %4011 = vrcp.f32 %v1091_v50  ;;  %v1271_v50 = vld [vmem:[%s4394_s30 + $0xf8] sm:$0xff] }
 0x45a   : > { %v4002_v37 = vpop.eup %4001  ;;  %3580 = vmatprep.mubr.msk.f32.mxu0 %vm1022_vm1, %v1096_v51  ;;  %v3815_v51 = vpack.c.bf16 %v1271_v50, %v1270_v49 }
 0x45b   : > { %v4004_v53 = vpop.eup %4003  ;;  %3581 = vmatmul.mubr.msk.f32.vlgmr.msra.gmra.mrb[16].mxu0 %vm1022_vm1, %v1098_v0  ;;  %v1102_v58 = vmul.f32 %v4002_v37, %v3986_v9  ;;  %v1255_v0 = vld [vmem:[%s4394_s30 + $0x78] sm:$0xff] }
 0x45c   : > { %v1100_v56 = vmul.f32 %v4004_v53, %v3988_v10  ;;  %3790 = vmatpush3.bf16.msra.mxu0 %v3789_v52  ;;  %v3799_v10 = vpack.c.bf16 %v1263_v1, %v1262_v63  ;;  %v1254_v52 = vld [vmem:[%s4394_s30 + $0x70] sm:$0xff] }
 0x45d   : > { %3792 = vmatprep.subr.bf16.mxu0 %v3791_v54  ;;  %v3817_v54 = vpack.c.bf16 %v1255_v0, %v1254_v52 }
 0x45e   : > { %v4006_v62 = vpop.eup %4005  ;;  %3583 = vmatprep.mubr.msk.f32.mxu0 %vm1022_vm1, %v1100_v56 }
 0x45f   : > { %v4008_v2 = vpop.eup %4007  ;;  %3584 = vmatmul.mubr.msk.f32.gmra.mrb[18].mxu0 %vm1022_vm1, %v1102_v58  ;;  %v1106_v9 = vmul.f32 %v4006_v62, %v4374_v16  ;;  %v3801_v16 = vpack.c.bf16 %v1247_v15, %v1246_v14  ;;  %v4442_v58 = vld [vmem:[%s4236_s20 + $0x8] sm:$0xff] }
 0x460   : > { %v1104_v3 = vmul.f32 %v4008_v2, %v4376_v17  ;;  %3794 = vmatpush3.bf16.msra.mxu0 %v3793_v57  ;;  %v1275_v60 = vrot.slane %v4442_v58, %v4239_v5 }
 0x461   : > { %3796 = vmatprep.subr.bf16.mxu0 %v3795_v59 }
 0x462   : > { %v4010_v18 = vpop.eup %4009  ;;  %3586 = vmatprep.mubr.msk.f32.mxu0 %vm1022_vm1, %v1104_v3 }
 0x463   : > { %v4012_v26 = vpop.eup %4011  ;;  %3587 = vmatmul.mubr.msk.f32.gmra.mrb[20].mxu0 %vm1022_vm1, %v1106_v9  ;;  %v1110_v27 = vmul.f32 %v4010_v18, %v4382_v22  ;;  %v3807_v22 = vpack.c.bf16 %v1267_v31, %v1266_v30 }
 0x464   : > { %v1108_v17 = vmul.f32 %v4012_v26, %v4384_v23  ;;  %3798 = vmatpush3.bf16.msra.mxu0 %v3797_v4  ;;  %v3805_v23 = vpack.c.bf16 %v1249_v12, %v1248_v29 }
 0x465   : > { %3800 = vmatprep.subr.bf16.mxu0 %v3799_v10 }
 0x466   : > { %3589 = vmatprep.mubr.msk.f32.mxu0 %vm1022_vm1, %v1108_v17 }
 0x467   : > { %3590 = vmatmul.mubr.msk.f32.gmra.mrb[22].mxu0 %vm1022_vm1, %v1110_v27 }
 0x468   : > { %3802 = vmatpush3.bf16.msra.mxu0 %v3801_v16 }
 0x469   : > { %3804 = vmatprep.subr.bf16.mxu0 %v3803_v28 }
 0x46c   : > { %3806 = vmatpush3.bf16.msra.mxu0 %v3805_v23 }
 0x46d   : > { %3808 = vmatprep.subr.bf16.mxu0 %v3807_v22 }
 0x470   : > { %3810 = vmatpush3.bf16.msra.mxu0 %v3809_v13 }
 0x471   : > { %3812 = vmatprep.subr.bf16.mxu0 %v3811_v42 }
 0x474   : > { %3814 = vmatpush3.bf16.msra.mxu0 %v3813_v47 }
 0x475   : > { %3816 = vmatprep.subr.bf16.mxu0 %v3815_v51 }
 0x478   : > { %3818 = vmatpush3.bf16.msra.mxu0 %v3817_v54  ;;  %v1433_v54 = vld [vmem:[%s4462_s13] sm:$0xff] }
 0x52e   : > { %v3582_v55 = vpop.f32.mrb[16].mxu0 }
 0x52f   : > { %v1201_v7 = vpop.f32.mrb[17].mxu0 }
 0x532   : > { %v3585_v37 = vpop.f32.mrb[18].mxu0 }
 0x533   : > { %v1211_v46 = vpop.f32.mrb[19].mxu0 }
 0x536   : > { %v3588_v48 = vpop.f32.mrb[20].mxu0 }
 0x537   : > { %v1221_v53 = vpop.f32.mrb[21].mxu0 }
 0x538   : > { %1340 = vmatprep.mubr.f32.mxu0 %v1221_v53 }
 0x539   : > { %1341 = vmatmul.mubr.f32.vlgmr.msra.gmra.mrb[24].mxu0 %v1201_v7 }
 0x53a   : > { %v3591_v56 = vpop.f32.mrb[22].mxu0  ;;  %1345 = vmatprep.mubr.f32.mxu0 %v3588_v48 }
 0x53b   : > { %v1231_v57 = vpop.f32.mrb[23].mxu0 }
 0x53d   : > { %1346 = vmatmul.mubr.f32.gmra.mrb[26].mxu0 %v3582_v55  ;;  %v1434_v55 = vld [vmem:[%s4462_s13 + $0x8] sm:$0xff] }
 0x53e   : > { %1350 = vmatprep.mubr.f32.mxu0 %v1231_v57  ;;  %v3819_v7 = vpack.c.bf16 %v1434_v55, %v1433_v54 }
 0x540   : > { %3820 = vmatprep.subr.bf16.mxu1 %v3819_v7 }
 0x541   : > { %1351 = vmatmul.mubr.f32.gmra.mrb[28].mxu0 %v1211_v46  ;;  %3822 = vmatpush3.bf16.msra.mxu1 %v3819_v7  ;;  %v1436_v46 = vld [vmem:[%s4462_s13 + $0x18] sm:$0xff] }
 0x542   : > { %1355 = vmatprep.mubr.f32.mxu0 %v3591_v56 }
 0x545   : > { %1356 = vmatmul.mubr.f32.gmra.mrb[30].mxu0 %v3585_v37  ;;  %v1435_v37 = vld [vmem:[%s4462_s13 + $0x10] sm:$0xff] }
 0x546   : > { %1945 = vmatprep.mubr.f32.mxu0 %v4111_v40  ;;  %v3823_v48 = vpack.c.bf16 %v1436_v46, %v1435_v37 }
 0x548   : > { %3824 = vmatprep.subr.bf16.mxu1 %v3823_v48 }
 0x549   : > { %3826 = vmatpush3.bf16.msra.mxu1 %v3823_v48 }
 0x60c   : > { %v3403_v59 = vpop.f32.mrb[24].mxu0 }
 0x60d   : > { %v3404_v61 = vpop.f32.mrb[25].mxu0 }
 0x60e   : > { %v3405_v62 = vadd.f32 %v3404_v61, %v3403_v59 }
 0x610   : > { %v1343_v63 = vadd.f32 %v3405_v62, %v1275_v60  ;;  %v3406_v1 = vpop.f32.mrb[26].mxu0 }
 0x611   : > { %v3407_v2 = vpop.f32.mrb[27].mxu0 }
 0x612   : > { %v3408_v3 = vadd.f32 %v3407_v2, %v3406_v1  ;;  %v1361_v4 = vadd.f32 %v1343_v63, %v4256_v25 }
 0x614   : > { %v1348_v9 = vadd.f32 %v3408_v3, %v1275_v60  ;;  %v3409_v10 = vpop.f32.mrb[28].mxu0  ;;  %v1365_v14 = vsel %vm480_vm0, %v1361_v4, 0.0 }
 0x615   : > { %v3410_v15 = vpop.f32.mrb[29].mxu0  ;;  %1366 = vadd.xlane.f32.xlu0 %v1365_v14 }
 0x616   : > { %v3411_v18 = vadd.f32 %v3410_v15, %v3409_v10  ;;  %v1362_v19 = vadd.f32 %v1348_v9, %v4268_v20  ;;  %v1428_v15 = vrot.slane %v4442_v58, %v4311_v38 }
 0x618   : > { %v1353_v24 = vadd.f32 %v3411_v18, %v1275_v60  ;;  %v3412_v26 = vpop.f32.mrb[30].mxu0  ;;  %v1368_v17 = vsel %vm480_vm0, %v1362_v19, 0.0 }
 0x619   : > { %v3413_v16 = vpop.f32.mrb[31].mxu0  ;;  %1369 = vadd.xlane.f32.xlu1 %v1368_v17 }
 0x61a   : > { %v3414_v27 = vadd.f32 %v3413_v16, %v3412_v26  ;;  %v1363_v28 = vadd.f32 %v1353_v24, %v4277_v34 }
 0x61c   : > { %v1358_v29 = vadd.f32 %v3414_v27, %v1275_v60  ;;  %v1371_v25 = vsel %vm480_vm0, %v1363_v28, 0.0 }
 0x61d   : > { %1372 = vadd.xlane.f32.xlu0 %v1371_v25 }
 0x61e   : > { %v1364_v12 = vadd.f32 %v1358_v29, %v4285_v21 }
 0x620   : > { %v1374_v30 = vsel %vm480_vm0, %v1364_v12, 0.0 }
 0x621   : > { %1375 = vadd.xlane.f32.xlu1 %v1374_v30 }
 0x6a2   : > { %v1367_v31 = vpop.xlane.xlu0 %1366 }
 0x6a3   : > { %v1377_v20 = vmul.f32 0.03125, %v1367_v31 }
 0x6a5   : > { %v1381_v23 = vsub.f32 %v1361_v4, %v1377_v20  ;;  %v1420_v4 = vrot.slane %v4442_v58, %v4314_v39 }
 0x6a6   : > { %v1370_v22 = vpop.xlane.xlu1 %1369 }
 0x6a7   : > { %v1378_v32 = vmul.f32 0.03125, %v1370_v22  ;;  %v1385_v33 = vmul.f32 %v1381_v23, %v1381_v23  ;;  %v1575_v22 = vld [vmem:[%s4492_s18 + $0x8] sm:$0xff] }
 0x6a9   : > { %v1382_v13 = vsub.f32 %v1362_v19, %v1378_v32  ;;  %v1389_v35 = vsel %vm480_vm0, %v1385_v33, 0.0  ;;  %v1576_v33 = vld [vmem:[%s4492_s18 + $0x10] sm:$0xff] }
 0x6aa   : > { %1390 = vadd.xlane.f32.xlu0 %v1389_v35  ;;  %v1373_v34 = vpop.xlane.xlu0 %1372 }
 0x6ab   : > { %v1379_v41 = vmul.f32 0.03125, %v1373_v34  ;;  %v1386_v42 = vmul.f32 %v1382_v13, %v1382_v13  ;;  %v1578_v34 = vld [vmem:[%s4492_s18 + $0x20] sm:$0xff] }
 0x6ad   : > { %v1383_v43 = vsub.f32 %v1363_v28, %v1379_v41  ;;  %v1392_v21 = vsel %vm480_vm0, %v1386_v42, 0.0  ;;  %v1579_v41 = vld [vmem:[%s4492_s18 + $0x28] sm:$0xff] }
 0x6ae   : > { %1393 = vadd.xlane.f32.xlu1 %v1392_v21  ;;  %v1376_v44 = vpop.xlane.xlu1 %1375  ;;  %v3835_v42 = vpack.c.bf16 %v1579_v41, %v1578_v34  ;;  %v1581_v21 = vld [vmem:[%s4492_s18 + $0x38] sm:$0xff]  ;;  %v1585_v41 = vrot.slane %v4442_v58, %v4304_v36 }
 0x6af   : > { %v1380_v47 = vmul.f32 0.03125, %v1376_v44  ;;  %v1387_v49 = vmul.f32 %v1383_v43, %v1383_v43 }
 0x6b1   : > { %v1384_v50 = vsub.f32 %v1364_v12, %v1380_v47  ;;  %v1395_v51 = vsel %vm480_vm0, %v1387_v49, 0.0  ;;  %v1440_v47 = vrot.slane %v4442_v58, %v4245_v8 }
 0x6b2   : > { %1396 = vadd.xlane.f32.xlu0 %v1395_v51 }
 0x6b3   : > { %v1388_v52 = vmul.f32 %v1384_v50, %v1384_v50 }
 0x6b5   : > { %v1398_v0 = vsel %vm480_vm0, %v1388_v52, 0.0 }
 0x6b6   : > { %1399 = vadd.xlane.f32.xlu1 %v1398_v0 }
 0x737   : > { %v1391_v53 = vpop.xlane.xlu0 %1390 }
 0x738   : > { %v1401_v56 = vmul.f32 0.03125, %v1391_v53 }
 0x73a   : > { %v1405_v57 = vadd.f32 1e-12, %v1401_v56 }
 0x73b   : > { %v1394_v59 = vpop.xlane.xlu1 %1393 }
 0x73c   : > { %4013 = vrsqrt.f32 %v1405_v57  ;;  %v1402_v60 = vmul.f32 0.03125, %v1394_v59 }
 0x73e   : > { %v1406_v61 = vadd.f32 1e-12, %v1402_v60 }
 0x73f   : > { %v1397_v62 = vpop.xlane.xlu0 %1396 }
 0x740   : > { %4015 = vrsqrt.f32 %v1406_v61  ;;  %v1403_v63 = vmul.f32 0.03125, %v1397_v62 }
 0x742   : > { %v1407_v1 = vadd.f32 1e-12, %v1403_v63 }
 0x743   : > { %v1400_v2 = vpop.xlane.xlu1 %1399 }
 0x744   : > { %4017 = vrsqrt.f32 %v1407_v1  ;;  %v1404_v3 = vmul.f32 0.03125, %v1400_v2 }
 0x746   : > { %v4014_v9 = vpop.eup %4013  ;;  %v1408_v10 = vadd.f32 1e-12, %v1404_v3 }
 0x747   : > { %v1413_v14 = vmul.f32 %v4014_v9, %v1381_v23  ;;  %v1574_v23 = vld [vmem:[%s4492_s18] sm:$0xff] }
 0x748   : > { %4019 = vrsqrt.f32 %v1408_v10  ;;  %v3827_v32 = vpack.c.bf16 %v1575_v22, %v1574_v23 }
 0x749   : > { %v1421_v18 = vmul.f32 %v1420_v4, %v1413_v14 }
 0x74a   : > { %v4016_v19 = vpop.eup %4015  ;;  %3828 = vmatprep.subr.bf16.mxu1 %v3827_v32 }
 0x74b   : > { %v1414_v24 = vmul.f32 %v4016_v19, %v1382_v13  ;;  %v4472_v26 = vadd.f32 %v1428_v15, %v1421_v18  ;;  %v1577_v13 = vld [vmem:[%s4492_s18 + $0x18] sm:$0xff] }
 0x74c   : > { %v3831_v35 = vpack.c.bf16 %v1577_v13, %v1576_v33 }
 0x74d   : > { %v1422_v17 = vmul.f32 %v1420_v4, %v1414_v24  ;;  %3600 = vmatprep.mubr.msk.f32.mxu1 %vm480_vm0, %v4472_v26 }
 0x74e   : > { %v4018_v16 = vpop.eup %4017 }
 0x74f   : > { %v4476_v27 = vadd.f32 %v1428_v15, %v1422_v17  ;;  %v1415_v28 = vmul.f32 %v4018_v16, %v1383_v43  ;;  %v1580_v43 = vld [vmem:[%s4492_s18 + $0x30] sm:$0xff] }
 0x750   : > { %v3839_v44 = vpack.c.bf16 %v1581_v21, %v1580_v43 }
 0x751   : > { %3601 = vmatmul.mubr.msk.f32.vlgmr.msra.gmra.mrb[16].mxu1 %vm480_vm0, %v4476_v27  ;;  %v1423_v29 = vmul.f32 %v1420_v4, %v1415_v28 }
 0x752   : > { %v4020_v25 = vpop.eup %4019  ;;  %3830 = vmatpush3.bf16.msra.mxu1 %v3827_v32 }
 0x753   : > { %v4480_v12 = vadd.f32 %v1428_v15, %v1423_v29  ;;  %v1416_v30 = vmul.f32 %v4020_v25, %v1384_v50  ;;  %3832 = vmatprep.subr.bf16.mxu1 %v3831_v35 }
 0x755   : > { %3603 = vmatprep.mubr.msk.f32.mxu1 %vm480_vm0, %v4480_v12  ;;  %v1424_v31 = vmul.f32 %v1420_v4, %v1416_v30 }
 0x756   : > { %3834 = vmatpush3.bf16.msra.mxu1 %v3831_v35 }
 0x757   : > { %v4484_v20 = vadd.f32 %v1428_v15, %v1424_v31  ;;  %3836 = vmatprep.subr.bf16.mxu1 %v3835_v42 }
 0x759   : > { %3604 = vmatmul.mubr.msk.f32.gmra.mrb[18].mxu1 %vm480_vm0, %v4484_v20 }
 0x75a   : > { %3838 = vmatpush3.bf16.msra.mxu1 %v3835_v42 }
 0x75b   : > { %3840 = vmatprep.subr.bf16.mxu1 %v3839_v44 }
 0x75e   : > { %3842 = vmatpush3.bf16.msra.mxu1 %v3839_v44 }
 0x824   : > { %v3602_v49 = vpop.f32.mrb[16].mxu1 }
 0x825   : > { %v1525_v50 = vadd.f32 %v3602_v49, %v1440_v47  ;;  %v1519_v51 = vpop.f32.mrb[17].mxu1 }
 0x826   : > { %v1520_v52 = vadd.f32 %v1519_v51, %v1440_v47 }
 0x827   : > { %v1543_v0 = vmul.f32 0.044715, %v1525_v50  ;;  %v1539_v29 = vmul.f32 0.5, %v1525_v50 }
 0x828   : > { %v1542_v54 = vmul.f32 0.044715, %v1520_v52  ;;  %v1538_v16 = vmul.f32 0.5, %v1520_v52 }
 0x829   : > { %v1547_v55 = vmul.f32 %v1543_v0, %v1525_v50 }
 0x82a   : > { %v1546_v7 = vmul.f32 %v1542_v54, %v1520_v52 }
 0x82b   : > { %v1551_v37 = vmul.f32 %v1547_v55, %v1525_v50 }
 0x82c   : > { %v1550_v46 = vmul.f32 %v1546_v7, %v1520_v52  ;;  %v3605_v48 = vpop.f32.mrb[18].mxu1 }
 0x82d   : > { %v1555_v53 = vadd.f32 %v1551_v37, %v1525_v50  ;;  %v1535_v56 = vadd.f32 %v3605_v48, %v1440_v47  ;;  %v1529_v57 = vpop.f32.mrb[19].mxu1 }
 0x82e   : > { %v1554_v59 = vadd.f32 %v1550_v46, %v1520_v52  ;;  %v1530_v60 = vadd.f32 %v1529_v57, %v1440_v47 }
 0x82f   : > { %v1559_v61 = vmul.f32 0.7978846, %v1555_v53  ;;  %v1545_v62 = vmul.f32 0.044715, %v1535_v56  ;;  %v1541_v13 = vmul.f32 0.5, %v1535_v56 }
 0x830   : > { %v1544_v63 = vmul.f32 0.044715, %v1530_v60  ;;  %v1558_v1 = vmul.f32 0.7978846, %v1554_v59  ;;  %v1540_v32 = vmul.f32 0.5, %v1530_v60 }
 0x831   : > { %4021 = vtanh.f32 %v1559_v61  ;;  %v1549_v2 = vmul.f32 %v1545_v62, %v1535_v56 }
 0x832   : > { %v1548_v3 = vmul.f32 %v1544_v63, %v1530_v60  ;;  %4023 = vtanh.f32 %v1558_v1 }
 0x833   : > { %v1553_v4 = vmul.f32 %v1549_v2, %v1535_v56 }
 0x834   : > { %v1552_v9 = vmul.f32 %v1548_v3, %v1530_v60 }
 0x835   : > { %v1557_v10 = vadd.f32 %v1553_v4, %v1535_v56 }
 0x836   : > { %v1556_v14 = vadd.f32 %v1552_v9, %v1530_v60 }
 0x837   : > { %v1561_v15 = vmul.f32 0.7978846, %v1557_v10 }
 0x838   : > { %v1560_v18 = vmul.f32 0.7978846, %v1556_v14 }
 0x839   : > { %4025 = vtanh.f32 %v1561_v15 }
 0x83a   : > { %4027 = vtanh.f32 %v1560_v18  ;;  %v3236_v18 = vld [vmem:[%s4204_s16 + $0xc8] sm:$0xff] }
 0x83b   : > { %v4022_v19 = vpop.eup %4021 }
 0x83c   : > { %v4024_v24 = vpop.eup %4023  ;;  %v1567_v17 = vadd.f32 1.0, %v4022_v19  ;;  %v3242_v19 = vld [vmem:[%s4204_s16 + $0xf8] sm:$0xff] }
 0x83d   : > { %v1566_v28 = vadd.f32 1.0, %v4024_v24  ;;  %v3238_v24 = vld [vmem:[%s4204_s16 + $0xd8] sm:$0xff] }
 0x83e   : > { %v1571_v30 = vmul.f32 %v1567_v17, %v1539_v29  ;;  %v3843_v17 = vpack.c.bf16 %v3242_v19, %v3236_v18  ;;  %v3241_v29 = vld [vmem:[%s4204_s16 + $0xf0] sm:$0xff] }
 0x83f   : > { %v1570_v25 = vmul.f32 %v1566_v28, %v1538_v16  ;;  %v3244_v16 = vld [vmem:[%s4204_s16 + $0x108] sm:$0xff]  ;;  %v3235_v28 = vld [vmem:[%s4204_s16 + $0xc0] sm:$0xff] }
 0x840   : > { %3844 = vmatprep.subr.bf16.mxu1 %v3843_v17 }
 0x841   : > { %3622 = vmatprep.mubr.msk.f32.mxu1 %vm1022_vm1, %v1570_v25  ;;  %v3851_v25 = vpack.c.bf16 %v3244_v16, %v3238_v24  ;;  %v3251_v16 = vld [vmem:[%s4204_s16 + $0x140] sm:$0xff] }
 0x842   : > { %3623 = vmatmul.mubr.msk.f32.vlgmr.msra.gmra.mrb[20].mxu1 %vm1022_vm1, %v1571_v30  ;;  %v3845_v30 = vpack.c.bf16 %v3241_v29, %v3235_v28  ;;  %v3257_v28 = vld [vmem:[%s4204_s16 + $0x170] sm:$0xff] }
 0x843   : > { %v4026_v31 = vpop.eup %4025  ;;  %3852 = vmatprep.subr.bf16.mxu0 %v3851_v25 }
 0x844   : > { %v4028_v23 = vpop.eup %4027  ;;  %v1569_v22 = vadd.f32 1.0, %v4026_v31  ;;  %v3237_v31 = vld [vmem:[%s4204_s16 + $0xd0] sm:$0xff]  ;;  %3846 = vmatpush1.bf16.msra.mxu1 %v3845_v30 }
 0x845   : > { %v1568_v33 = vadd.f32 1.0, %v4028_v23  ;;  %v3243_v23 = vld [vmem:[%s4204_s16 + $0x100] sm:$0xff] }
 0x846   : > { %v1573_v34 = vmul.f32 %v1569_v22, %v1541_v13  ;;  %v3853_v22 = vpack.c.bf16 %v3243_v23, %v3237_v31  ;;  %v3250_v13 = vld [vmem:[%s4204_s16 + $0x138] sm:$0xff] }
 0x847   : > { %v1572_v35 = vmul.f32 %v1568_v33, %v1540_v32  ;;  %v3248_v32 = vld [vmem:[%s4204_s16 + $0x128] sm:$0xff]  ;;  %v3254_v33 = vld [vmem:[%s4204_s16 + $0x158] sm:$0xff] }
 0x848   : > { %3854 = vmatpush1.bf16.msra.mxu0 %v3853_v22 }
 0x849   : > { %3625 = vmatprep.mubr.msk.f32.mxu1 %vm1022_vm1, %v1572_v35  ;;  %v3847_v35 = vpack.c.bf16 %v3254_v33, %v3248_v32  ;;  %v4618_v33 = vld [vmem:[%s4236_s20 + $0x10] sm:$0xff] }
 0x84a   : > { %3626 = vmatmul.mubr.msk.f32.gmra.mrb[22].mxu1 %vm1022_vm1, %v1573_v34  ;;  %v3256_v34 = vld [vmem:[%s4204_s16 + $0x168] sm:$0xff] }
 0x84b   : > { %1856 = vmatprep.mubr.f32.mxu1 %v4111_v40  ;;  %3848 = vmatprep.subr.bf16.mxu1 %v3847_v35 }
 0x915   : > { %v3624_v42 = vpop.f32.mrb[20].mxu1 }
 0x916   : > { %v1670_v43 = vadd.f32 %v3624_v42, %v1585_v41  ;;  %v1664_v21 = vpop.f32.mrb[21].mxu1  ;;  %v3253_v42 = vld [vmem:[%s4204_s16 + $0x150] sm:$0xff] }
 0x917   : > { %v1665_v44 = vadd.f32 %v1664_v21, %v1585_v41 }
 0x918   : > { %v1684_v47 = vadd.f32 %v1670_v43, %v4476_v27  ;;  %v3855_v43 = vpack.c.bf16 %v3256_v34, %v3250_v13 }
 0x919   : > { %v1683_v49 = vadd.f32 %v1665_v44, %v4472_v26  ;;  %v3249_v44 = vld [vmem:[%s4204_s16 + $0x130] sm:$0xff] }
 0x91a   : > { %v1690_v50 = vsel %vm480_vm0, %v1684_v47, 0.0  ;;  %3856 = vmatprep.subr.bf16.mxu0 %v3855_v43 }
 0x91b   : > { %1691 = vadd.xlane.f32.xlu1 %v1690_v50  ;;  %v1687_v51 = vsel %vm480_vm0, %v1683_v49, 0.0  ;;  %v3240_v50 = vld [vmem:[%s4204_s16 + $0xe8] sm:$0xff] }
 0x91c   : > { %1688 = vadd.xlane.f32.xlu0 %v1687_v51  ;;  %v3246_v51 = vld [vmem:[%s4204_s16 + $0x118] sm:$0xff] }
 0x91d   : > { %v3627_v52 = vpop.f32.mrb[22].mxu1 }
 0x91e   : > { %v1680_v0 = vadd.f32 %v3627_v52, %v1585_v41  ;;  %v1674_v54 = vpop.f32.mrb[23].mxu1  ;;  %v3859_v52 = vpack.c.bf16 %v3246_v51, %v3240_v50 }
 0x91f   : > { %v1675_v55 = vadd.f32 %v1674_v54, %v1585_v41  ;;  %v3247_v41 = vld [vmem:[%s4204_s16 + $0x120] sm:$0xff] }
 0x920   : > { %v1686_v7 = vadd.f32 %v1680_v0, %v4484_v20  ;;  %v3849_v21 = vpack.c.bf16 %v3253_v42, %v3247_v41  ;;  %v2094_v41 = vrot.slane %v4618_v33, %v4245_v8 }
 0x921   : > { %v1685_v37 = vadd.f32 %v1675_v55, %v4480_v12 }
 0x922   : > { %v1696_v46 = vsel %vm480_vm0, %v1686_v7, 0.0  ;;  %3850 = vmatpush1.bf16.msra.mxu1 %v3849_v21  ;;  %v2078_v21 = vrot.slane %v4618_v33, %v4239_v5 }
 0x923   : > { %1697 = vadd.xlane.f32.xlu1 %v1696_v46  ;;  %v1693_v27 = vsel %vm480_vm0, %v1685_v37, 0.0  ;;  %3860 = vmatprep.subr.bf16.mxu1 %v3859_v52 }
 0x924   : > { %1694 = vadd.xlane.f32.xlu0 %v1693_v27 }
 0x9a8   : > { %v1692_v26 = vpop.xlane.xlu1 %1691 }
 0x9a9   : > { %v1700_v48 = vmul.f32 0.03125, %v1692_v26  ;;  %v1689_v53 = vpop.xlane.xlu0 %1688 }
 0x9aa   : > { %v1699_v56 = vmul.f32 0.03125, %v1689_v53 }
 0x9ab   : > { %v4519_v57 = vsub.f32 %v1684_v47, %v1700_v48  ;;  %v3255_v47 = vld [vmem:[%s4204_s16 + $0x160] sm:$0xff] }
 0x9ac   : > { %v4521_v59 = vsub.f32 %v1683_v49, %v1699_v56  ;;  %v3857_v49 = vpack.c.bf16 %v3255_v47, %v3249_v44 }
 0x9ad   : > { %v1708_v60 = vmul.f32 %v4519_v57, %v4519_v57 }
 0x9ae   : > { %v1707_v12 = vmul.f32 %v4521_v59, %v4521_v59  ;;  %3858 = vmatpush1.bf16.msra.mxu0 %v3857_v49 }
 0x9af   : > { %v1714_v20 = vsel %vm480_vm0, %v1708_v60, 0.0 }
 0x9b0   : > { %1715 = vadd.xlane.f32.xlu1 %v1714_v20  ;;  %v1698_v61 = vpop.xlane.xlu1 %1697  ;;  %v1711_v62 = vsel %vm480_vm0, %v1707_v12, 0.0  ;;  %v1742_v20 = vrot.slane %v4442_v58, %v4338_v45 }
 0x9b1   : > { %v1702_v63 = vmul.f32 0.03125, %v1698_v61  ;;  %1712 = vadd.xlane.f32.xlu0 %v1711_v62  ;;  %v1695_v1 = vpop.xlane.xlu0 %1694  ;;  %v1750_v62 = vrot.slane %v4442_v58, %v4328_v6 }
 0x9b2   : > { %v1701_v2 = vmul.f32 0.03125, %v1695_v1  ;;  %v3239_v1 = vld [vmem:[%s4204_s16 + $0xe0] sm:$0xff] }
 0x9b3   : > { %v4529_v3 = vsub.f32 %v1686_v7, %v1702_v63 }
 0x9b4   : > { %v4531_v4 = vsub.f32 %v1685_v37, %v1701_v2  ;;  %v3245_v2 = vld [vmem:[%s4204_s16 + $0x110] sm:$0xff] }
 0x9b5   : > { %v1710_v9 = vmul.f32 %v4529_v3, %v4529_v3  ;;  %v3861_v18 = vpack.c.bf16 %v3245_v2, %v3239_v1  ;;  %v2086_v2 = vrot.slane %v4618_v33, %v4314_v39 }
 0x9b6   : > { %v1709_v10 = vmul.f32 %v4531_v4, %v4531_v4 }
 0x9b7   : > { %v1720_v14 = vsel %vm480_vm0, %v1710_v9, 0.0 }
 0x9b8   : > { %1721 = vadd.xlane.f32.xlu1 %v1720_v14  ;;  %v1717_v15 = vsel %vm480_vm0, %v1709_v10, 0.0  ;;  %v3252_v10 = vld [vmem:[%s4204_s16 + $0x148] sm:$0xff]  ;;  %v3258_v14 = vld [vmem:[%s4204_s16 + $0x178] sm:$0xff] }
 0x9b9   : > { %1718 = vadd.xlane.f32.xlu0 %v1717_v15  ;;  %v3863_v17 = vpack.c.bf16 %v3258_v14, %v3252_v10  ;;  %v2102_v10 = vrot.slane %v4618_v33, %v4311_v38 }
 0xa3d   : > { %v1716_v0 = vpop.xlane.xlu1 %1715 }
 0xa3e   : > { %v1724_v54 = vmul.f32 0.03125, %v1716_v0  ;;  %v1713_v55 = vpop.xlane.xlu0 %1712 }
 0xa3f   : > { %v1723_v7 = vmul.f32 0.03125, %v1713_v55 }
 0xa40   : > { %v1728_v37 = vadd.f32 1e-12, %v1724_v54 }
 0xa41   : > { %v1727_v46 = vadd.f32 1e-12, %v1723_v7 }
 0xa42   : > { %4029 = vrsqrt.f32 %v1728_v37 }
 0xa43   : > { %4031 = vrsqrt.f32 %v1727_v46 }
 0xa45   : > { %v1722_v27 = vpop.xlane.xlu1 %1721 }
 0xa46   : > { %v1726_v26 = vmul.f32 0.03125, %v1722_v27  ;;  %v1719_v48 = vpop.xlane.xlu0 %1718 }
 0xa47   : > { %v1725_v53 = vmul.f32 0.03125, %v1719_v48 }
 0xa48   : > { %v1730_v56 = vadd.f32 1e-12, %v1726_v26 }
 0xa49   : > { %v1729_v60 = vadd.f32 1e-12, %v1725_v53 }
 0xa4a   : > { %4033 = vrsqrt.f32 %v1730_v56 }
 0xa4b   : > { %4035 = vrsqrt.f32 %v1729_v60 }
 0xa4c   : > { %v4030_v12 = vpop.eup %4029 }
 0xa4d   : > { %v4032_v61 = vpop.eup %4031  ;;  %v1736_v9 = vmul.f32 %v4030_v12, %v4519_v57  ;;  %v3865_v57 = vpack.c.bf16 %v3257_v28, %v3251_v16 }
 0xa4e   : > { %v1735_v63 = vmul.f32 %v4032_v61, %v4521_v59 }
 0xa4f   : > { %v1744_v24 = vmul.f32 %v1742_v20, %v1736_v9 }
 0xa50   : > { %v1743_v15 = vmul.f32 %v1742_v20, %v1735_v63 }
 0xa51   : > { %v4577_v25 = vadd.f32 %v1750_v62, %v1744_v24 }
 0xa52   : > { %v4567_v19 = vadd.f32 %v1750_v62, %v1743_v15 }
 0xa54   : > { %v4034_v29 = vpop.eup %4033  ;;  %3259 = vmatmul.mubr.msk.f32.vlgmr.msra.gmra.mrb[24].mxu1 %vm480_vm0, %v4567_v19  ;;  %3263 = vmatmul.mubr.msk.f32.vlgmr.msra.gmra.mrb[32].mxu0 %vm480_vm0, %v4567_v19 }
 0xa55   : > { %v4036_v59 = vpop.eup %4035  ;;  %3862 = vmatpush1.bf16.msra.mxu1 %v3861_v18  ;;  %1862 = vmatprep.mubr.f32.mxu1 %v4111_v40  ;;  %v1738_v31 = vmul.f32 %v4034_v29, %v4529_v3 }
 0xa56   : > { %1951 = vmatprep.mubr.f32.mxu0 %v4111_v40  ;;  %v1737_v30 = vmul.f32 %v4036_v59, %v4531_v4  ;;  %3864 = vmatprep.subr.bf16.mxu1 %v3863_v17  ;;  %v4615_v4 = vrot.slane %v4442_v58, %v4331_v11 }
 0xa57   : > { %v1746_v32 = vmul.f32 %v1742_v20, %v1738_v31 }
 0xa58   : > { %3260 = vmatmul.mubr.msk.f32.gmra.mrb[26].mxu1 %vm480_vm0, %v4577_v25  ;;  %3264 = vmatmul.mubr.msk.f32.gmra.mrb[34].mxu0 %vm480_vm0, %v4577_v25  ;;  %v1745_v23 = vmul.f32 %v1742_v20, %v1737_v30 }
 0xa59   : > { %1868 = vmatprep.mubr.f32.mxu1 %v4111_v40  ;;  %1957 = vmatprep.mubr.f32.mxu0 %v4111_v40  ;;  %v4595_v3 = vadd.f32 %v1750_v62, %v1746_v32 }
 0xa5a   : > { %v4587_v22 = vadd.f32 %v1750_v62, %v1745_v23  ;;  %3866 = vmatpush1.bf16.msra.mxu1 %v3865_v57 }
 0xa5c   : > { %3261 = vmatmul.mubr.msk.f32.gmra.mrb[28].mxu1 %vm480_vm0, %v4587_v22  ;;  %3265 = vmatmul.mubr.msk.f32.gmra.mrb[36].mxu0 %vm480_vm0, %v4587_v22 }
 0xa5d   : > { %1874 = vmatprep.mubr.f32.mxu1 %v4111_v40  ;;  %1963 = vmatprep.mubr.f32.mxu0 %v4111_v40 }
 0xa60   : > { %3262 = vmatmul.mubr.msk.f32.gmra.mrb[30].mxu1 %vm480_vm0, %v4595_v3  ;;  %3266 = vmatmul.mubr.msk.f32.gmra.mrb[38].mxu0 %vm480_vm0, %v4595_v3 }
 0xa61   : > { %2034 = vmatprep.mubr.f32.mxu1 %v4111_v40 }
 0xa64   : > { %3267 = vmatmul.mubr.msk.f32.vlgmr.msra.gmra.mrb[32].mxu1 %vm480_vm0, %v4567_v19 }
 0xa65   : > { %2040 = vmatprep.mubr.f32.mxu1 %v4111_v40 }
 0xa68   : > { %3268 = vmatmul.mubr.msk.f32.gmra.mrb[34].mxu1 %vm480_vm0, %v4577_v25 }
 0xa69   : > { %2046 = vmatprep.mubr.f32.mxu1 %v4111_v40 }
 0xa6c   : > { %3269 = vmatmul.mubr.msk.f32.gmra.mrb[36].mxu1 %vm480_vm0, %v4587_v22 }
 0xa6d   : > { %2052 = vmatprep.mubr.f32.mxu1 %v4111_v40 }
 0xa70   : > { %3270 = vmatmul.mubr.msk.f32.gmra.mrb[38].mxu1 %vm480_vm0, %v4595_v3 }
 0xb27   : > { %v1858_v13 = vpop.f32.mrb[24].mxu1  ;;  %v1947_v35 = vpop.f32.mrb[32].mxu0 }
 0xb28   : > { %v2063_v34 = vadd.f32 %v4615_v4, %v1858_v13  ;;  %v1860_v42 = vpop.f32.mrb[25].mxu1  ;;  %v4623_v43 = vpop.f32.mrb[33].mxu0  ;;  %v2095_v58 = vadd.f32 %v2094_v41, %v1947_v35 }
 0xb29   : > { %v2079_v52 = vadd.f32 %v2078_v21, %v1860_v42  ;;  %v2070_v42 = vrot.slane %v4618_v33, %v4304_v36 }
 0xb2a   : > { %3644 = vmatprep.mubr.f32.mxu0 %v2063_v34 }
 0xb2b   : > { %v1864_v44 = vpop.f32.mrb[26].mxu1  ;;  %v1953_v47 = vpop.f32.mrb[34].mxu0 }
 0xb2c   : > { %v2096_v49 = vadd.f32 %v2094_v41, %v1953_v47  ;;  %v1866_v50 = vpop.f32.mrb[27].mxu1  ;;  %v4627_v51 = vpop.f32.mrb[35].mxu0 }
 0xb2d   : > { %v2080_v0 = vadd.f32 %v2078_v21, %v1866_v50 }
 0xb2e   : > { %v3883_v54 = vpack.c.bf16 %v2096_v49, %v2095_v58  ;;  %v2071_v58 = vadd.f32 %v2070_v42, %v4623_v43  ;;  %v2072_v49 = vadd.f32 %v2070_v42, %v4627_v51  ;;  %v4096_v43 = vld [vmem:[%s4352_s24] sm:$0xff] }
 0xb2f   : > { %v3867_v55 = vpack.c.bf16 %v2080_v0, %v2079_v52  ;;  %v1870_v7 = vpop.f32.mrb[28].mxu1  ;;  %v1959_v37 = vpop.f32.mrb[36].mxu0 }
 0xb30   : > { %v1872_v46 = vpop.f32.mrb[29].mxu1  ;;  %v1961_v27 = vpop.f32.mrb[37].mxu0  ;;  %3884 = vmatprep.subr.bf16.mxu1 %v3883_v54  ;;  %v2097_v53 = vadd.f32 %v2094_v41, %v1959_v37 }
 0xb31   : > { %3868 = vmatprep.subr.bf16.mxu0 %v3867_v55  ;;  %3886 = vmatpush3.bf16.msra.mxu1 %v3883_v54  ;;  %v2081_v20 = vadd.f32 %v2078_v21, %v1872_v46  ;;  %v2073_v50 = vadd.f32 %v2070_v42, %v1961_v27 }
 0xb32   : > { %3870 = vmatpush3.bf16.xpose.msra.mxu0 %v3867_v55 }
 0xb33   : > { %v1876_v26 = vpop.f32.mrb[30].mxu1  ;;  %v1965_v48 = vpop.f32.mrb[38].mxu0 }
 0xb34   : > { %v2098_v56 = vadd.f32 %v2094_v41, %v1965_v48  ;;  %v1878_v60 = vpop.f32.mrb[31].mxu1  ;;  %v1967_v12 = vpop.f32.mrb[39].mxu0  ;;  %v2064_v41 = vadd.f32 %v4615_v4, %v1864_v44  ;;  %v2066_v47 = vadd.f32 %v4615_v4, %v1876_v26 }
 0xb35   : > { %v2082_v61 = vadd.f32 %v2078_v21, %v1878_v60  ;;  %v2065_v21 = vadd.f32 %v4615_v4, %v1870_v7  ;;  %v2074_v44 = vadd.f32 %v2070_v42, %v1967_v12  ;;  %v4095_v7 = vld [vmem:[%s4352_s24 + $0x8] sm:$0xff] }
 0xb36   : > { %v3887_v62 = vpack.c.bf16 %v2098_v56, %v2097_v53  ;;  %v4097_v56 = vld [vmem:[%s4352_s24 + $0x18] sm:$0xff] }
 0xb37   : > { %v3871_v63 = vpack.c.bf16 %v2082_v61, %v2081_v20  ;;  %v2036_v1 = vpop.f32.mrb[32].mxu1  ;;  %v4098_v20 = vld [vmem:[%s4352_s24 + $0x10] sm:$0xff] }
 0xb38   : > { %v2038_v9 = vpop.f32.mrb[33].mxu1  ;;  %3888 = vmatprep.subr.bf16.mxu1 %v3887_v62  ;;  %v2087_v15 = vadd.f32 %v2086_v2, %v2036_v1 }
 0xb39   : > { %3872 = vmatprep.subr.bf16.mxu0 %v3871_v63  ;;  %3890 = vmatpush3.bf16.msra.mxu1 %v3887_v62  ;;  %v2103_v17 = vadd.f32 %v2102_v10, %v2038_v9 }
 0xb3a   : > { %3874 = vmatpush3.bf16.xpose.msra.mxu0 %v3871_v63 }
 0xb3b   : > { %v2042_v14 = vpop.f32.mrb[34].mxu1 }
 0xb3c   : > { %v2088_v18 = vadd.f32 %v2086_v2, %v2042_v14  ;;  %v2044_v24 = vpop.f32.mrb[35].mxu1 }
 0xb3d   : > { %v2104_v16 = vadd.f32 %v2102_v10, %v2044_v24 }
 0xb3e   : > { %v3875_v28 = vpack.c.bf16 %v2088_v18, %v2087_v15  ;;  %v4100_v18 = vld [vmem:[%s4352_s24 + $0x20] sm:$0xff] }
 0xb3f   : > { %v3891_v29 = vpack.c.bf16 %v2104_v16, %v2103_v17  ;;  %v2048_v59 = vpop.f32.mrb[36].mxu1 }
 0xb40   : > { %v2050_v57 = vpop.f32.mrb[37].mxu1  ;;  %3876 = vmatprep.subr.bf16.mxu0 %v3875_v28  ;;  %v2089_v31 = vadd.f32 %v2086_v2, %v2048_v59 }
 0xb41   : > { %3892 = vmatprep.subr.bf16.mxu1 %v3891_v29  ;;  %v2105_v32 = vadd.f32 %v2102_v10, %v2050_v57  ;;  %v4101_v57 = vld [vmem:[%s4352_s24 + $0x38] sm:$0xff] }
 0xb42   : > { %3878 = vmatpush3.bf16.xpose.msra.mxu0 %v3875_v28  ;;  %3894 = vmatpush3.bf16.msra.mxu1 %v3891_v29 }
 0xb43   : > { %v2054_v30 = vpop.f32.mrb[38].mxu1 }
 0xb44   : > { %v2090_v38 = vadd.f32 %v2086_v2, %v2054_v30  ;;  %v2056_v23 = vpop.f32.mrb[39].mxu1 }
 0xb45   : > { %v2106_v13 = vadd.f32 %v2102_v10, %v2056_v23  ;;  %v4099_v10 = vld [vmem:[%s4352_s24 + $0x28] sm:$0xff] }
 0xb46   : > { %v3879_v35 = vpack.c.bf16 %v2090_v38, %v2089_v31  ;;  %v4102_v31 = vld [vmem:[%s4352_s24 + $0x30] sm:$0xff] }
 0xb47   : > { %v3895_v34 = vpack.c.bf16 %v2106_v13, %v2105_v32 }
 0xb48   : > { %3880 = vmatprep.subr.bf16.mxu0 %v3879_v35 }
 0xb49   : > { %3896 = vmatprep.subr.bf16.mxu1 %v3895_v34 }
 0xb4a   : > { %3882 = vmatpush3.bf16.xpose.msra.mxu0 %v3879_v35  ;;  %3898 = vmatpush3.bf16.msra.mxu1 %v3895_v34 }
 0xb51   : > { %3645 = vmatmul.mubr.f32.vlgmr.msra.gmra.mrb[40].mxu0 %v2064_v41 }
 0xb52   : > { %3647 = vmatprep.mubr.f32.mxu0 %v2065_v21 }
 0xb55   : > { %3648 = vmatmul.mubr.f32.gmra.mrb[42].mxu0 %v2066_v47 }
 0xb56   : > { %3650 = vmatprep.mubr.f32.mxu0 %v2071_v58 }
 0xb59   : > { %3651 = vmatmul.mubr.f32.gmra.mrb[44].mxu0 %v2072_v49 }
 0xb5a   : > { %3653 = vmatprep.mubr.f32.mxu0 %v2073_v50 }
 0xb5d   : > { %3654 = vmatmul.mubr.f32.gmra.mrb[46].mxu0 %v2074_v44 }
 0xc24   : > { %v3646_v52 = vpop.f32.mrb[40].mxu0 }
 0xc25   : > { %v2213_v0 = vmul.f32 0.25, %v3646_v52  ;;  %v2173_v54 = vpop.f32.mrb[41].mxu0 }
 0xc26   : > { %v2212_v55 = vmul.f32 0.25, %v2173_v54 }
 0xc27   : > { %v2221_v4 = vadd.f32 %v4095_v7, %v2213_v0 }
 0xc28   : > { %v3649_v37 = vpop.f32.mrb[42].mxu0  ;;  %v2220_v46 = vadd.f32 %v4096_v43, %v2212_v55 }
 0xc29   : > { %v2215_v26 = vmul.f32 0.25, %v3649_v37  ;;  %v2183_v48 = vpop.f32.mrb[43].mxu0  ;;  %v2231_v51 = vsel %vm1022_vm1, %v2221_v4, -inf }
 0xc2a   : > { %v2214_v27 = vmul.f32 0.25, %v2183_v48  ;;  %2232 = vmax.xlane.f32.xlu1 %v2231_v51  ;;  %v2228_v53 = vsel %vm1022_vm1, %v2220_v46, -inf }
 0xc2b   : > { %2229 = vmax.xlane.f32.xlu0 %v2228_v53  ;;  %v2223_v60 = vadd.f32 %v4097_v56, %v2215_v26 }
 0xc2c   : > { %v3652_v12 = vpop.f32.mrb[44].mxu0  ;;  %v2222_v61 = vadd.f32 %v4098_v20, %v2214_v27 }
 0xc2d   : > { %v2217_v62 = vmul.f32 0.25, %v3652_v12  ;;  %v2193_v63 = vpop.f32.mrb[45].mxu0  ;;  %v2237_v1 = vsel %vm1022_vm1, %v2223_v60, -inf }
 0xc2e   : > { %v2216_v2 = vmul.f32 0.25, %v2193_v63  ;;  %2238 = vmax.xlane.f32.xlu1 %v2237_v1  ;;  %v2234_v9 = vsel %vm1022_vm1, %v2222_v61, -inf }
 0xc2f   : > { %2235 = vmax.xlane.f32.xlu0 %v2234_v9  ;;  %v2225_v14 = vadd.f32 %v4099_v10, %v2217_v62 }
 0xc30   : > { %v3655_v15 = vpop.f32.mrb[46].mxu0  ;;  %v2224_v24 = vadd.f32 %v4100_v18, %v2216_v2 }
 0xc31   : > { %v2219_v17 = vmul.f32 0.25, %v3655_v15  ;;  %v2203_v16 = vpop.f32.mrb[47].mxu0  ;;  %v2243_v28 = vsel %vm1022_vm1, %v2225_v14, -inf }
 0xc32   : > { %v2218_v29 = vmul.f32 0.25, %v2203_v16  ;;  %2244 = vmax.xlane.f32.xlu1 %v2243_v28  ;;  %v2240_v59 = vsel %vm1022_vm1, %v2224_v24, -inf  ;;  %v3296_v16 = vld [vmem:[%s4394_s30 + $0x188] sm:$0xff] }
 0xc33   : > { %2241 = vmax.xlane.f32.xlu0 %v2240_v59  ;;  %v2227_v30 = vadd.f32 %v4101_v57, %v2219_v17  ;;  %v3295_v17 = vld [vmem:[%s4394_s30 + $0x180] sm:$0xff] }
 0xc34   : > { %v2226_v38 = vadd.f32 %v4102_v31, %v2218_v29  ;;  %v3899_v28 = vpack.c.bf16 %v3296_v16, %v3295_v17 }
 0xc35   : > { %v2249_v23 = vsel %vm1022_vm1, %v2227_v30, -inf }
 0xc36   : > { %2250 = vmax.xlane.f32.xlu1 %v2249_v23  ;;  %v2246_v32 = vsel %vm1022_vm1, %v2226_v38, -inf  ;;  %3900 = vmatprep.subr.bf16.mxu1 %v3899_v28  ;;  %v3279_v23 = vld [vmem:[%s4394_s30 + $0x100] sm:$0xff] }
 0xc37   : > { %2247 = vmax.xlane.f32.xlu0 %v2246_v32  ;;  %v3280_v32 = vld [vmem:[%s4394_s30 + $0x108] sm:$0xff]  ;;  %v3287_v28 = vld [vmem:[%s4394_s30 + $0x140] sm:$0xff] }
 0xcb7   : > { %v2233_v13 = vpop.xlane.xlu1 %2232 }
 0xcb8   : > { %v2253_v35 = vsub.f32 %v2221_v4, %v2233_v13  ;;  %v2230_v34 = vpop.xlane.xlu0 %2229 }
 0xcb9   : > { %v2252_v41 = vsub.f32 %v2220_v46, %v2230_v34  ;;  %v3298_v34 = vld [vmem:[%s4394_s30 + $0x198] sm:$0xff] }
 0xcba   : > { %v2262_v42 = vmul.f32 1.442695, %v2253_v35  ;;  %v3297_v35 = vld [vmem:[%s4394_s30 + $0x190] sm:$0xff] }
 0xcbb   : > { %v2260_v21 = vmul.f32 1.442695, %v2252_v41  ;;  %v2239_v47 = vpop.xlane.xlu1 %2238 }
 0xcbc   : > { %4037 = vpow2.f32 %v2262_v42  ;;  %v2255_v58 = vsub.f32 %v2223_v60, %v2239_v47  ;;  %v2236_v49 = vpop.xlane.xlu0 %2235 }
 0xcbd   : > { %4039 = vpow2.f32 %v2260_v21  ;;  %v2254_v50 = vsub.f32 %v2222_v61, %v2236_v49 }
 0xcbe   : > { %v2266_v44 = vmul.f32 1.442695, %v2255_v58  ;;  %v3901_v58 = vpack.c.bf16 %v3280_v32, %v3279_v23  ;;  %v3307_v23 = vld [vmem:[%s4394_s30 + $0x1e0] sm:$0xff]  ;;  %v3308_v32 = vld [vmem:[%s4394_s30 + $0x1e8] sm:$0xff] }
 0xcbf   : > { %v2264_v52 = vmul.f32 1.442695, %v2254_v50  ;;  %v2245_v0 = vpop.xlane.xlu1 %2244  ;;  %v3903_v50 = vpack.c.bf16 %v3298_v34, %v3297_v35  ;;  %v3291_v35 = vld [vmem:[%s4394_s30 + $0x160] sm:$0xff]  ;;  %v3292_v34 = vld [vmem:[%s4394_s30 + $0x168] sm:$0xff] }
 0xcc0   : > { %4041 = vpow2.f32 %v2266_v44  ;;  %v2257_v54 = vsub.f32 %v2225_v14, %v2245_v0  ;;  %v2242_v55 = vpop.xlane.xlu0 %2241  ;;  %v3281_v44 = vld [vmem:[%s4394_s30 + $0x110] sm:$0xff] }
 0xcc1   : > { %4043 = vpow2.f32 %v2264_v52  ;;  %v2256_v7 = vsub.f32 %v2224_v24, %v2242_v55  ;;  %v3282_v52 = vld [vmem:[%s4394_s30 + $0x118] sm:$0xff]  ;;  %v3300_v55 = vld [vmem:[%s4394_s30 + $0x1a8] sm:$0xff] }
 0xcc2   : > { %v2270_v37 = vmul.f32 1.442695, %v2257_v54  ;;  %v3299_v54 = vld [vmem:[%s4394_s30 + $0x1a0] sm:$0xff] }
 0xcc3   : > { %v2268_v4 = vmul.f32 1.442695, %v2256_v7  ;;  %v2251_v43 = vpop.xlane.xlu1 %2250 }
 0xcc4   : > { %4045 = vpow2.f32 %v2270_v37  ;;  %v2259_v46 = vsub.f32 %v2227_v30, %v2251_v43  ;;  %v2248_v26 = vpop.xlane.xlu0 %2247 }
 0xcc5   : > { %4047 = vpow2.f32 %v2268_v4  ;;  %v2258_v48 = vsub.f32 %v2226_v38, %v2248_v26  ;;  %v3905_v4 = vpack.c.bf16 %v3282_v52, %v3281_v44  ;;  %v3283_v26 = vld [vmem:[%s4394_s30 + $0x120] sm:$0xff] }
 0xcc6   : > { %v4038_v51 = vpop.eup %4037  ;;  %v2274_v27 = vmul.f32 1.442695, %v2259_v46  ;;  %v3907_v46 = vpack.c.bf16 %v3300_v55, %v3299_v54 }
 0xcc7   : > { %v4040_v53 = vpop.eup %4039  ;;  %v2272_v56 = vmul.f32 1.442695, %v2258_v48  ;;  %v2279_v60 = vsel %vm1022_vm1, %v4038_v51, 0.0  ;;  %v3284_v48 = vld [vmem:[%s4394_s30 + $0x128] sm:$0xff] }
 0xcc8   : > { %4049 = vpow2.f32 %v2274_v27  ;;  %2280 = vadd.xlane.f32.xlu1 %v2279_v60  ;;  %v2276_v12 = vsel %vm1022_vm1, %v4040_v53, 0.0  ;;  %v3301_v27 = vld [vmem:[%s4394_s30 + $0x1b0] sm:$0xff] }
 0xcc9   : > { %4051 = vpow2.f32 %v2272_v56  ;;  %2277 = vadd.xlane.f32.xlu0 %v2276_v12  ;;  %v3909_v12 = vpack.c.bf16 %v3284_v48, %v3283_v26 }
 0xcca   : > { %v4042_v20 = vpop.eup %4041 }
 0xccb   : > { %v4044_v61 = vpop.eup %4043  ;;  %v2285_v62 = vsel %vm1022_vm1, %v4042_v20, 0.0 }
 0xccc   : > { %2286 = vadd.xlane.f32.xlu1 %v2285_v62  ;;  %v2282_v63 = vsel %vm1022_vm1, %v4044_v61, 0.0  ;;  %v3285_v62 = vld [vmem:[%s4394_s30 + $0x130] sm:$0xff] }
 0xccd   : > { %2283 = vadd.xlane.f32.xlu0 %v2282_v63  ;;  %v3286_v63 = vld [vmem:[%s4394_s30 + $0x138] sm:$0xff] }
 0xcce   : > { %v4660_v1 = vpop.eup %4045 }
 0xccf   : > { %v4662_v2 = vpop.eup %4047  ;;  %v2291_v9 = vsel %vm1022_vm1, %v4660_v1, 0.0 }
 0xcd0   : > { %2292 = vadd.xlane.f32.xlu1 %v2291_v9  ;;  %v2288_v10 = vsel %vm1022_vm1, %v4662_v2, 0.0 }
 0xcd1   : > { %2289 = vadd.xlane.f32.xlu0 %v2288_v10  ;;  %v3303_v10 = vld [vmem:[%s4394_s30 + $0x1c0] sm:$0xff] }
 0xcd2   : > { %v4668_v14 = vpop.eup %4049 }
 0xcd3   : > { %v4670_v15 = vpop.eup %4051  ;;  %v2297_v18 = vsel %vm1022_vm1, %v4668_v14, 0.0 }
 0xcd4   : > { %2298 = vadd.xlane.f32.xlu1 %v2297_v18  ;;  %v2294_v24 = vsel %vm1022_vm1, %v4670_v15, 0.0  ;;  %v3304_v18 = vld [vmem:[%s4394_s30 + $0x1c8] sm:$0xff] }
 0xcd5   : > { %2295 = vadd.xlane.f32.xlu0 %v2294_v24  ;;  %v3915_v16 = vpack.c.bf16 %v3304_v18, %v3303_v10 }
 0xd55   : > { %v2281_v29 = vpop.xlane.xlu1 %2280 }
 0xd56   : > { %4053 = vrcp.f32 %v2281_v29  ;;  %v2278_v59 = vpop.xlane.xlu0 %2277  ;;  %v3288_v29 = vld [vmem:[%s4394_s30 + $0x148] sm:$0xff] }
 0xd57   : > { %4055 = vrcp.f32 %v2278_v59  ;;  %v3305_v59 = vld [vmem:[%s4394_s30 + $0x1d0] sm:$0xff] }
 0xd59   : > { %v2287_v57 = vpop.xlane.xlu1 %2286 }
 0xd5a   : > { %4057 = vrcp.f32 %v2287_v57  ;;  %v2284_v30 = vpop.xlane.xlu0 %2283  ;;  %v3306_v57 = vld [vmem:[%s4394_s30 + $0x1d8] sm:$0xff] }
 0xd5b   : > { %4059 = vrcp.f32 %v2284_v30  ;;  %v3289_v30 = vld [vmem:[%s4394_s30 + $0x150] sm:$0xff] }
 0xd5d   : > { %v2293_v31 = vpop.xlane.xlu1 %2292 }
 0xd5e   : > { %4061 = vrcp.f32 %v2293_v31  ;;  %v2290_v38 = vpop.xlane.xlu0 %2289  ;;  %v3290_v31 = vld [vmem:[%s4394_s30 + $0x158] sm:$0xff] }
 0xd5f   : > { %4063 = vrcp.f32 %v2290_v38  ;;  %v3921_v38 = vpack.c.bf16 %v3290_v31, %v3289_v30 }
 0xd60   : > { %v4054_v13 = vpop.eup %4053 }
 0xd61   : > { %v4056_v41 = vpop.eup %4055  ;;  %v2299_v42 = vpop.xlane.xlu1 %2298  ;;  %v2303_v49 = vmul.f32 %v4054_v13, %v4038_v51  ;;  %v3923_v13 = vpack.c.bf16 %v3308_v32, %v3307_v23 }
 0xd62   : > { %4065 = vrcp.f32 %v2299_v42  ;;  %v2296_v21 = vpop.xlane.xlu0 %2295  ;;  %v2301_v47 = vmul.f32 %v4056_v41, %v4040_v53  ;;  %v3302_v53 = vld [vmem:[%s4394_s30 + $0x1b8] sm:$0xff]  ;;  %v3925_v41 = vpack.c.bf16 %v3292_v34, %v3291_v35  ;;  %v3309_v42 = vld [vmem:[%s4394_s30 + $0x1f0] sm:$0xff] }
 0xd63   : > { %4067 = vrcp.f32 %v2296_v21  ;;  %v3310_v21 = vld [vmem:[%s4394_s30 + $0x1f8] sm:$0xff] }
 0xd64   : > { %v4058_v0 = vpop.eup %4057  ;;  %3672 = vmatprep.mubr.msk.f32.mxu1 %vm1022_vm1, %v2301_v47  ;;  %v3927_v47 = vpack.c.bf16 %v3310_v21, %v3309_v42 }
 0xd65   : > { %v4060_v7 = vpop.eup %4059  ;;  %3673 = vmatmul.mubr.msk.f32.vlgmr.msra.gmra.mrb[40].mxu1 %vm1022_vm1, %v2303_v49  ;;  %v2307_v43 = vmul.f32 %v4058_v0, %v4042_v20  ;;  %v3294_v49 = vld [vmem:[%s4394_s30 + $0x178] sm:$0xff] }
 0xd66   : > { %v2305_v37 = vmul.f32 %v4060_v7, %v4044_v61  ;;  %3902 = vmatpush3.bf16.msra.mxu1 %v3901_v58  ;;  %v3911_v61 = vpack.c.bf16 %v3302_v53, %v3301_v27  ;;  %v3293_v58 = vld [vmem:[%s4394_s30 + $0x170] sm:$0xff] }
 0xd67   : > { %3904 = vmatprep.subr.bf16.mxu1 %v3903_v50  ;;  %v3929_v50 = vpack.c.bf16 %v3294_v49, %v3293_v58  ;;  %v3311_v58 = vld [vmem:[%s4462_s13 + $0x20] sm:$0xff]  ;;  %v3312_v49 = vld [vmem:[%s4462_s13 + $0x28] sm:$0xff] }
 0xd68   : > { %v4062_v51 = vpop.eup %4061  ;;  %3675 = vmatprep.mubr.msk.f32.mxu1 %vm1022_vm1, %v2305_v37 }
 0xd69   : > { %v4064_v56 = vpop.eup %4063  ;;  %3676 = vmatmul.mubr.msk.f32.gmra.mrb[42].mxu1 %vm1022_vm1, %v2307_v43  ;;  %v2311_v20 = vmul.f32 %v4062_v51, %v4660_v1  ;;  %v3913_v1 = vpack.c.bf16 %v3286_v63, %v3285_v62 }
 0xd6a   : > { %v2309_v60 = vmul.f32 %v4064_v56, %v4662_v2  ;;  %3906 = vmatpush3.bf16.msra.mxu1 %v3905_v4 }
 0xd6b   : > { %3908 = vmatprep.subr.bf16.mxu1 %v3907_v46  ;;  %v2481_v46 = vrot.slane %v4618_v33, %v4338_v45 }
 0xd6c   : > { %v4066_v9 = vpop.eup %4065  ;;  %3678 = vmatprep.mubr.msk.f32.mxu1 %vm1022_vm1, %v2309_v60 }
 0xd6d   : > { %v4068_v24 = vpop.eup %4067  ;;  %3679 = vmatmul.mubr.msk.f32.gmra.mrb[44].mxu1 %vm1022_vm1, %v2311_v20  ;;  %v2315_v17 = vmul.f32 %v4066_v9, %v4668_v14  ;;  %v3919_v14 = vpack.c.bf16 %v3306_v57, %v3305_v59 }
 0xd6e   : > { %v2313_v2 = vmul.f32 %v4068_v24, %v4670_v15  ;;  %3910 = vmatpush3.bf16.msra.mxu1 %v3909_v12  ;;  %v3917_v15 = vpack.c.bf16 %v3288_v29, %v3287_v28 }
 0xd6f   : > { %3912 = vmatprep.subr.bf16.mxu1 %v3911_v61 }
 0xd70   : > { %3681 = vmatprep.mubr.msk.f32.mxu1 %vm1022_vm1, %v2313_v2 }
 0xd71   : > { %3682 = vmatmul.mubr.msk.f32.gmra.mrb[46].mxu1 %vm1022_vm1, %v2315_v17 }
 0xd72   : > { %3914 = vmatpush3.bf16.msra.mxu1 %v3913_v1 }
 0xd73   : > { %3916 = vmatprep.subr.bf16.mxu1 %v3915_v16 }
 0xd76   : > { %3918 = vmatpush3.bf16.msra.mxu1 %v3917_v15 }
 0xd77   : > { %3920 = vmatprep.subr.bf16.mxu1 %v3919_v14 }
 0xd7a   : > { %3922 = vmatpush3.bf16.msra.mxu1 %v3921_v38 }
 0xd7b   : > { %3924 = vmatprep.subr.bf16.mxu1 %v3923_v13 }
 0xd7e   : > { %3926 = vmatpush3.bf16.msra.mxu1 %v3925_v41 }
 0xd7f   : > { %3928 = vmatprep.subr.bf16.mxu1 %v3927_v47 }
 0xd82   : > { %3930 = vmatpush3.bf16.msra.mxu1 %v3929_v50  ;;  %v3931_v50 = vpack.c.bf16 %v3312_v49, %v3311_v58 }
 0xd84   : > { %3932 = vmatprep.subr.bf16.mxu0 %v3931_v50 }
 0xd85   : > { %3934 = vmatpush3.bf16.msra.mxu0 %v3931_v50 }
 0xe38   : > { %v3674_v44 = vpop.f32.mrb[40].mxu1 }
 0xe39   : > { %v2406_v52 = vpop.f32.mrb[41].mxu1 }
 0xe3c   : > { %v3677_v0 = vpop.f32.mrb[42].mxu1 }
 0xe3d   : > { %v2416_v54 = vpop.f32.mrb[43].mxu1 }
 0xe40   : > { %v3680_v55 = vpop.f32.mrb[44].mxu1 }
 0xe41   : > { %v2426_v7 = vpop.f32.mrb[45].mxu1 }
 0xe42   : > { %2546 = vmatprep.mubr.f32.mxu1 %v2426_v7 }
 0xe43   : > { %2547 = vmatmul.mubr.f32.vlgmr.msra.gmra.mrb[48].mxu1 %v2406_v52  ;;  %v3314_v52 = vld [vmem:[%s4462_s13 + $0x38] sm:$0xff] }
 0xe44   : > { %v3683_v37 = vpop.f32.mrb[46].mxu1  ;;  %2551 = vmatprep.mubr.f32.mxu1 %v3680_v55 }
 0xe45   : > { %v2436_v4 = vpop.f32.mrb[47].mxu1 }
 0xe47   : > { %2552 = vmatmul.mubr.f32.gmra.mrb[50].mxu1 %v3674_v44  ;;  %v3313_v44 = vld [vmem:[%s4462_s13 + $0x30] sm:$0xff] }
 0xe48   : > { %2556 = vmatprep.mubr.f32.mxu1 %v2436_v4 }
 0xe4b   : > { %2557 = vmatmul.mubr.f32.gmra.mrb[52].mxu1 %v2416_v54 }
 0xe4c   : > { %2561 = vmatprep.mubr.f32.mxu1 %v3683_v37 }
 0xe4f   : > { %2562 = vmatmul.mubr.f32.gmra.mrb[54].mxu1 %v3677_v0  ;;  %v3935_v0 = vpack.c.bf16 %v3314_v52, %v3313_v44 }
 0xe51   : > { %3936 = vmatprep.subr.bf16.mxu0 %v3935_v0 }
 0xe52   : > { %3938 = vmatpush3.bf16.msra.mxu0 %v3935_v0 }
 0xf16   : > { %v3499_v43 = vpop.f32.mrb[48].mxu1 }
 0xf17   : > { %v3500_v26 = vpop.f32.mrb[49].mxu1 }
 0xf18   : > { %v3501_v48 = vadd.f32 %v3500_v26, %v3499_v43 }
 0xf1a   : > { %v2549_v51 = vadd.f32 %v3501_v48, %v2481_v46  ;;  %v3502_v27 = vpop.f32.mrb[50].mxu1  ;;  %v4739_v48 = vld [vmem:[%s4236_s20 + $0x18] sm:$0xf]  ;;  %s425_s20 = scalar_lea.vmem %s4808_s2, %s3192_s12 }
 0xf1b   : > { %v3503_v53 = vpop.f32.mrb[51].mxu1 }
 0xf1c   : > { %v3504_v56 = vadd.f32 %v3503_v53, %v3502_v27  ;;  %v2567_v60 = vadd.f32 %v2549_v51, %v4567_v19 }
 0xf1e   : > { %v2554_v12 = vadd.f32 %v3504_v56, %v2481_v46  ;;  %v3505_v20 = vpop.f32.mrb[52].mxu1  ;;  %v2571_v61 = vsel %vm480_vm0, %v2567_v60, 0.0  ;;  %v2626_v56 = vrot.slane %v4739_v48, %v4239_v5 }
 0xf1f   : > { %v3506_v62 = vpop.f32.mrb[53].mxu1  ;;  %2572 = vadd.xlane.f32.xlu0 %v2571_v61  ;;  %v2634_v61 = vrot.slane %v4739_v48, %v4245_v8 }
 0xf20   : > { %v3507_v63 = vadd.f32 %v3506_v62, %v3505_v20  ;;  %v2568_v9 = vadd.f32 %v2554_v12, %v4577_v25 }
 0xf22   : > { %v2559_v10 = vadd.f32 %v3507_v63, %v2481_v46  ;;  %v3508_v18 = vpop.f32.mrb[54].mxu1  ;;  %v2574_v45 = vsel %vm480_vm0, %v2568_v9, 0.0 }
 0xf23   : > { %v3509_v24 = vpop.f32.mrb[55].mxu1  ;;  %2575 = vadd.xlane.f32.xlu1 %v2574_v45 }
 0xf24   : > { %v3510_v2 = vadd.f32 %v3509_v24, %v3508_v18  ;;  %v2569_v1 = vadd.f32 %v2559_v10, %v4587_v22 }
 0xf26   : > { %v2564_v17 = vadd.f32 %v3510_v2, %v2481_v46  ;;  %v2577_v19 = vsel %vm480_vm0, %v2569_v1, 0.0 }
 0xf27   : > { %2578 = vadd.xlane.f32.xlu0 %v2577_v19 }
 0xf28   : > { %v2570_v16 = vadd.f32 %v2564_v17, %v4595_v3 }
 0xf2a   : > { %v2580_v28 = vsel %vm480_vm0, %v2570_v16, 0.0 }
 0xf2b   : > { %2581 = vadd.xlane.f32.xlu1 %v2580_v28  ;;  %v3319_v28 = vld [vmem:[%s4492_s18 + $0x40] sm:$0xff] }
 0xfac   : > { %v2573_v29 = vpop.xlane.xlu0 %2572 }
 0xfad   : > { %v2583_v25 = vmul.f32 0.03125, %v2573_v29  ;;  %v3320_v29 = vld [vmem:[%s4492_s18 + $0x48] sm:$0xff] }
 0xfaf   : > { %v2587_v59 = vsub.f32 %v2567_v60, %v2583_v25  ;;  %v3939_v25 = vpack.c.bf16 %v3320_v29, %v3319_v28 }
 0xfb0   : > { %v2576_v57 = vpop.xlane.xlu1 %2575 }
 0xfb1   : > { %v2584_v15 = vmul.f32 0.03125, %v2576_v57  ;;  %v2591_v14 = vmul.f32 %v2587_v59, %v2587_v59  ;;  %3940 = vmatprep.subr.bf16.mxu0 %v3939_v25  ;;  %v3322_v57 = vld [vmem:[%s4492_s18 + $0x58] sm:$0xff] }
 0xfb3   : > { %v2588_v30 = vsub.f32 %v2568_v9, %v2584_v15  ;;  %v2595_v31 = vsel %vm480_vm0, %v2591_v14, 0.0  ;;  %v3323_v14 = vld [vmem:[%s4492_s18 + $0x60] sm:$0xff] }
 0xfb4   : > { %2596 = vadd.xlane.f32.xlu0 %v2595_v31  ;;  %v2579_v22 = vpop.xlane.xlu0 %2578 }
 0xfb5   : > { %v2585_v38 = vmul.f32 0.03125, %v2579_v22  ;;  %v2592_v23 = vmul.f32 %v2588_v30, %v2588_v30  ;;  %v3325_v22 = vld [vmem:[%s4492_s18 + $0x70] sm:$0xff] }
 0xfb7   : > { %v2589_v32 = vsub.f32 %v2569_v1, %v2585_v38  ;;  %v2598_v3 = vsel %vm480_vm0, %v2592_v23, 0.0  ;;  %v3326_v38 = vld [vmem:[%s4492_s18 + $0x78] sm:$0xff] }
 0xfb8   : > { %2599 = vadd.xlane.f32.xlu1 %v2598_v3  ;;  %v2582_v13 = vpop.xlane.xlu1 %2581  ;;  %v3951_v23 = vpack.c.bf16 %v3326_v38, %v3325_v22 }
 0xfb9   : > { %v2586_v35 = vmul.f32 0.03125, %v2582_v13  ;;  %v2593_v34 = vmul.f32 %v2589_v32, %v2589_v32 }
 0xfbb   : > { %v2590_v41 = vsub.f32 %v2570_v16, %v2586_v35  ;;  %v2601_v42 = vsel %vm480_vm0, %v2593_v34, 0.0 }
 0xfbc   : > { %2602 = vadd.xlane.f32.xlu0 %v2601_v42 }
 0xfbd   : > { %v2594_v21 = vmul.f32 %v2590_v41, %v2590_v41 }
 0xfbf   : > { %v2604_v47 = vsel %vm480_vm0, %v2594_v21, 0.0 }
 0xfc0   : > { %2605 = vadd.xlane.f32.xlu1 %v2604_v47 }
0x1041   : > { %v2597_v54 = vpop.xlane.xlu0 %2596 }
0x1042   : > { %v2607_v55 = vmul.f32 0.03125, %v2597_v54 }
0x1044   : > { %v2611_v7 = vadd.f32 1e-12, %v2607_v55 }
0x1045   : > { %v2600_v37 = vpop.xlane.xlu1 %2599 }
0x1046   : > { %4069 = vrsqrt.f32 %v2611_v7  ;;  %v2608_v4 = vmul.f32 0.03125, %v2600_v37 }
0x1048   : > { %v2612_v43 = vadd.f32 1e-12, %v2608_v4 }
0x1049   : > { %v2603_v46 = vpop.xlane.xlu0 %2602 }
0x104a   : > { %4071 = vrsqrt.f32 %v2612_v43  ;;  %v2609_v26 = vmul.f32 0.03125, %v2603_v46 }
0x104c   : > { %v2613_v51 = vadd.f32 1e-12, %v2609_v26 }
0x104d   : > { %v2606_v27 = vpop.xlane.xlu1 %2605 }
0x104e   : > { %4073 = vrsqrt.f32 %v2613_v51  ;;  %v2610_v53 = vmul.f32 0.03125, %v2606_v27 }
0x1050   : > { %v4070_v60 = vpop.eup %4069  ;;  %v2614_v12 = vadd.f32 1e-12, %v2610_v53 }
0x1051   : > { %v2619_v20 = vmul.f32 %v4070_v60, %v2587_v59  ;;  %v3321_v59 = vld [vmem:[%s4492_s18 + $0x50] sm:$0xff] }
0x1052   : > { %4075 = vrsqrt.f32 %v2614_v12  ;;  %v3943_v15 = vpack.c.bf16 %v3322_v57, %v3321_v59  ;;  %v2793_v59 = vrot.slane %v4618_v33, %v4331_v11 }
0x1053   : > { %v2627_v62 = vmul.f32 %v2626_v56, %v2619_v20 }
0x1054   : > { %v4072_v63 = vpop.eup %4071 }
0x1055   : > { %v2620_v9 = vmul.f32 %v4072_v63, %v2588_v30  ;;  %v4745_v10 = vadd.f32 %v2634_v61, %v2627_v62  ;;  %v3324_v30 = vld [vmem:[%s4492_s18 + $0x68] sm:$0xff] }
0x1056   : > { %v3947_v31 = vpack.c.bf16 %v3324_v30, %v3323_v14 }
0x1057   : > { %v2628_v18 = vmul.f32 %v2626_v56, %v2620_v9  ;;  %3692 = vmatprep.mubr.msk.f32.mxu0 %vm480_vm0, %v4745_v10 }
0x1058   : > { %v4074_v45 = vpop.eup %4073 }
0x1059   : > { %v4749_v5 = vadd.f32 %v2634_v61, %v2628_v18  ;;  %v2621_v24 = vmul.f32 %v4074_v45, %v2589_v32  ;;  %v2647_v32 = vrot.slane %v4618_v33, %v4328_v6 }
0x105b   : > { %3693 = vmatmul.mubr.msk.f32.vlgmr.msra.gmra.mrb[48].mxu0 %vm480_vm0, %v4749_v5  ;;  %v2629_v8 = vmul.f32 %v2626_v56, %v2621_v24 }
0x105c   : > { %v4076_v2 = vpop.eup %4075  ;;  %3942 = vmatpush3.bf16.msra.mxu0 %v3939_v25 }
0x105d   : > { %v4753_v1 = vadd.f32 %v2634_v61, %v2629_v8  ;;  %v2622_v17 = vmul.f32 %v4076_v2, %v2590_v41  ;;  %3944 = vmatprep.subr.bf16.mxu0 %v3943_v15 }
0x105f   : > { %3695 = vmatprep.mubr.msk.f32.mxu0 %vm480_vm0, %v4753_v1  ;;  %v2630_v19 = vmul.f32 %v2626_v56, %v2622_v17 }
0x1060   : > { %3946 = vmatpush3.bf16.msra.mxu0 %v3943_v15 }
0x1061   : > { %v4757_v16 = vadd.f32 %v2634_v61, %v2630_v19  ;;  %3948 = vmatprep.subr.bf16.mxu0 %v3947_v31 }
0x1063   : > { %3696 = vmatmul.mubr.msk.f32.gmra.mrb[50].mxu0 %vm480_vm0, %v4757_v16 }
0x1064   : > { %3950 = vmatpush3.bf16.msra.mxu0 %v3947_v31 }
0x1065   : > { %3952 = vmatprep.subr.bf16.mxu0 %v3951_v23 }
0x1068   : > { %3954 = vmatpush3.bf16.msra.mxu0 %v3951_v23 }
0x112e   : > { %v3694_v3 = vpop.f32.mrb[48].mxu0 }
0x112f   : > { %v2732_v13 = vadd.f32 %v3694_v3, %v2647_v32  ;;  %v2726_v35 = vpop.f32.mrb[49].mxu0 }
0x1130   : > { %v2727_v34 = vadd.f32 %v2726_v35, %v2647_v32 }
0x1131   : > { %v2750_v41 = vmul.f32 0.044715, %v2732_v13  ;;  %v2746_v9 = vmul.f32 0.5, %v2732_v13 }
0x1132   : > { %v2749_v42 = vmul.f32 0.044715, %v2727_v34  ;;  %v2745_v62 = vmul.f32 0.5, %v2727_v34 }
0x1133   : > { %v2754_v21 = vmul.f32 %v2750_v41, %v2732_v13 }
0x1134   : > { %v2753_v47 = vmul.f32 %v2749_v42, %v2727_v34 }
0x1135   : > { %v2758_v58 = vmul.f32 %v2754_v21, %v2732_v13 }
0x1136   : > { %v2757_v49 = vmul.f32 %v2753_v47, %v2727_v34  ;;  %v3697_v50 = vpop.f32.mrb[50].mxu0 }
0x1137   : > { %v2762_v44 = vadd.f32 %v2758_v58, %v2732_v13  ;;  %v2742_v52 = vadd.f32 %v3697_v50, %v2647_v32  ;;  %v2736_v0 = vpop.f32.mrb[51].mxu0 }
0x1138   : > { %v2761_v54 = vadd.f32 %v2757_v49, %v2727_v34  ;;  %v2737_v55 = vadd.f32 %v2736_v0, %v2647_v32 }
0x1139   : > { %v2766_v7 = vmul.f32 0.7978846, %v2762_v44  ;;  %v2752_v37 = vmul.f32 0.044715, %v2742_v52  ;;  %v2748_v28 = vmul.f32 0.5, %v2742_v52 }
0x113a   : > { %v2751_v4 = vmul.f32 0.044715, %v2737_v55  ;;  %v2765_v6 = vmul.f32 0.7978846, %v2761_v54  ;;  %v2747_v17 = vmul.f32 0.5, %v2737_v55 }
0x113b   : > { %4077 = vtanh.f32 %v2766_v7  ;;  %v2756_v43 = vmul.f32 %v2752_v37, %v2742_v52 }
0x113c   : > { %v2755_v46 = vmul.f32 %v2751_v4, %v2737_v55  ;;  %4079 = vtanh.f32 %v2765_v6 }
0x113d   : > { %v2760_v26 = vmul.f32 %v2756_v43, %v2742_v52 }
0x113e   : > { %v2759_v51 = vmul.f32 %v2755_v46, %v2737_v55  ;;  %v4112_v46 = vmov 0.0|0.0  }
0x113f   : > { %v2764_v27 = vadd.f32 %v2760_v26, %v2742_v52  ;;  %3955 = vmatprep.subr.bf16.mxu0 %v4112_v46 }
0x1140   : > { %v2763_v53 = vadd.f32 %v2759_v51, %v2737_v55 }
0x1141   : > { %v2768_v56 = vmul.f32 0.7978846, %v2764_v27 }
0x1142   : > { %v2767_v60 = vmul.f32 0.7978846, %v2763_v53 }
0x1143   : > { %4081 = vtanh.f32 %v2768_v56 }
0x1144   : > { %4083 = vtanh.f32 %v2767_v60 }
0x1145   : > { %v4078_v12 = vpop.eup %4077 }
0x1146   : > { %v4080_v20 = vpop.eup %4079  ;;  %v2774_v61 = vadd.f32 1.0, %v4078_v12 }
0x1147   : > { %v2773_v63 = vadd.f32 1.0, %v4080_v20 }
0x1148   : > { %v2778_v45 = vmul.f32 %v2774_v61, %v2746_v9 }
0x1149   : > { %v2777_v18 = vmul.f32 %v2773_v63, %v2745_v62 }
0x114b   : > { %3714 = vmatprep.mubr.msk.f32.mxu0 %vm1022_vm1, %v2777_v18  ;;  %v2950_v18 = vrot.slane %v4739_v48, %v4304_v36 }
0x114c   : > { %3715 = vmatmul.mubr.msk.f32.vlgmr.msra.gmra.mrb[52].mxu0 %vm1022_vm1, %v2778_v45 }
0x114d   : > { %v4082_v24 = vpop.eup %4081 }
0x114e   : > { %v4084_v8 = vpop.eup %4083  ;;  %v2776_v2 = vadd.f32 1.0, %v4082_v24 }
0x114f   : > { %v2775_v19 = vadd.f32 1.0, %v4084_v8  ;;  %v2958_v8 = vrot.slane %v4739_v48, %v4314_v39  ;;  %v475_v48 = vld [vmem:[%s425_s20] sm:$0xf] }
0x1150   : > { %v2780_v25 = vmul.f32 %v2776_v2, %v2748_v28 }
0x1151   : > { %v2779_v29 = vmul.f32 %v2775_v19, %v2747_v17 }
0x1153   : > { %3717 = vmatprep.mubr.msk.f32.mxu0 %vm1022_vm1, %v2779_v29 }
0x1154   : > { %3718 = vmatmul.mubr.msk.f32.gmra.mrb[54].mxu0 %vm1022_vm1, %v2780_v25 }
0x1155   : > { %3728 = vmatprep.mubr.msk.f32.mxu0 %vm4113_vm2, %v4111_v40 }
0x121f   : > { %v3716_v57 = vpop.f32.mrb[52].mxu0 }
0x1220   : > { %v2878_v15 = vadd.f32 %v3716_v57, %v2793_v59  ;;  %v2872_v14 = vpop.f32.mrb[53].mxu0 }
0x1221   : > { %v2873_v30 = vadd.f32 %v2872_v14, %v2793_v59 }
0x1222   : > { %v2892_v31 = vadd.f32 %v2878_v15, %v4749_v5 }
0x1223   : > { %v2891_v22 = vadd.f32 %v2873_v30, %v4745_v10 }
0x1224   : > { %v2898_v38 = vsel %vm480_vm0, %v2892_v31, 0.0 }
0x1225   : > { %2899 = vadd.xlane.f32.xlu1 %v2898_v38  ;;  %v2895_v23 = vsel %vm480_vm0, %v2891_v22, 0.0 }
0x1226   : > { %2896 = vadd.xlane.f32.xlu0 %v2895_v23 }
0x1227   : > { %v3719_v32 = vpop.f32.mrb[54].mxu0 }
0x1228   : > { %v2888_v3 = vadd.f32 %v3719_v32, %v2793_v59  ;;  %v2882_v13 = vpop.f32.mrb[55].mxu0 }
0x1229   : > { %v2883_v35 = vadd.f32 %v2882_v13, %v2793_v59 }
0x122a   : > { %v2894_v11 = vadd.f32 %v2888_v3, %v4757_v16 }
0x122b   : > { %v2893_v33 = vadd.f32 %v2883_v35, %v4753_v1 }
0x122c   : > { %v2904_v34 = vsel %vm480_vm0, %v2894_v11, 0.0 }
0x122d   : > { %2905 = vadd.xlane.f32.xlu1 %v2904_v34  ;;  %v2901_v5 = vsel %vm480_vm0, %v2893_v33, 0.0 }
0x122e   : > { %2902 = vadd.xlane.f32.xlu0 %v2901_v5 }
0x12b2   : > { %v2900_v10 = vpop.xlane.xlu1 %2899 }
0x12b3   : > { %v2908_v41 = vmul.f32 0.03125, %v2900_v10  ;;  %v2897_v42 = vpop.xlane.xlu0 %2896 }
0x12b4   : > { %v2907_v21 = vmul.f32 0.03125, %v2897_v42 }
0x12b5   : > { %v2912_v47 = vsub.f32 %v2892_v31, %v2908_v41 }
0x12b6   : > { %v2911_v58 = vsub.f32 %v2891_v22, %v2907_v21 }
0x12b7   : > { %v2916_v49 = vmul.f32 %v2912_v47, %v2912_v47 }
0x12b8   : > { %v2915_v50 = vmul.f32 %v2911_v58, %v2911_v58 }
0x12b9   : > { %v2922_v44 = vsel %vm480_vm0, %v2916_v49, 0.0 }
0x12ba   : > { %2923 = vadd.xlane.f32.xlu1 %v2922_v44  ;;  %v2906_v16 = vpop.xlane.xlu1 %2905  ;;  %v2919_v1 = vsel %vm480_vm0, %v2915_v50, 0.0 }
0x12bb   : > { %v2910_v52 = vmul.f32 0.03125, %v2906_v16  ;;  %2920 = vadd.xlane.f32.xlu0 %v2919_v1  ;;  %v2903_v0 = vpop.xlane.xlu0 %2902 }
0x12bc   : > { %v2909_v54 = vmul.f32 0.03125, %v2903_v0 }
0x12bd   : > { %v2914_v55 = vsub.f32 %v2894_v11, %v2910_v52 }
0x12be   : > { %v2913_v7 = vsub.f32 %v2893_v33, %v2909_v54 }
0x12bf   : > { %v2918_v37 = vmul.f32 %v2914_v55, %v2914_v55 }
0x12c0   : > { %v2917_v4 = vmul.f32 %v2913_v7, %v2913_v7 }
0x12c1   : > { %v2928_v6 = vsel %vm480_vm0, %v2918_v37, 0.0 }
0x12c2   : > { %2929 = vadd.xlane.f32.xlu1 %v2928_v6  ;;  %v2925_v43 = vsel %vm480_vm0, %v2917_v4, 0.0 }
0x12c3   : > { %2926 = vadd.xlane.f32.xlu0 %v2925_v43 }
0x1347   : > { %v2924_v26 = vpop.xlane.xlu1 %2923 }
0x1348   : > { %v2932_v51 = vmul.f32 0.03125, %v2924_v26  ;;  %v2921_v27 = vpop.xlane.xlu0 %2920 }
0x1349   : > { %v2931_v53 = vmul.f32 0.03125, %v2921_v27 }
0x134a   : > { %v2936_v56 = vadd.f32 1e-12, %v2932_v51 }
0x134b   : > { %v2935_v60 = vadd.f32 1e-12, %v2931_v53 }
0x134c   : > { %4085 = vrsqrt.f32 %v2936_v56 }
0x134d   : > { %4087 = vrsqrt.f32 %v2935_v60 }
0x134f   : > { %v2930_v12 = vpop.xlane.xlu1 %2929 }
0x1350   : > { %v2934_v20 = vmul.f32 0.03125, %v2930_v12  ;;  %v2927_v61 = vpop.xlane.xlu0 %2926 }
0x1351   : > { %v2933_v62 = vmul.f32 0.03125, %v2927_v61 }
0x1352   : > { %v2938_v63 = vadd.f32 1e-12, %v2934_v20 }
0x1353   : > { %v2937_v9 = vadd.f32 1e-12, %v2933_v62 }
0x1354   : > { %4089 = vrsqrt.f32 %v2938_v63 }
0x1355   : > { %4091 = vrsqrt.f32 %v2937_v9 }
0x1356   : > { %v4086_v40 = vpop.eup %4085 }
0x1357   : > { %v4088_v45 = vpop.eup %4087  ;;  %v2944_v24 = vmul.f32 %v4086_v40, %v2912_v47 }
0x1358   : > { %v2943_v2 = vmul.f32 %v4088_v45, %v2911_v58 }
0x1359   : > { %v2952_v17 = vmul.f32 %v2950_v18, %v2944_v24 }
0x135a   : > { %v2951_v19 = vmul.f32 %v2950_v18, %v2943_v2 }
0x135b   : > { %v2960_v28 = vadd.f32 %v2958_v8, %v2952_v17 }
0x135c   : > { %v2959_v29 = vadd.f32 %v2958_v8, %v2951_v19 }
0x135e   : > { %v4090_v25 = vpop.eup %4089  ;;  %v3956_v59 = vpack.c.bf16 %v2960_v28, %v2959_v29 }
0x135f   : > { %v4092_v57 = vpop.eup %4091  ;;  %v2946_v15 = vmul.f32 %v4090_v25, %v2914_v55 }
0x1360   : > { %v2945_v14 = vmul.f32 %v4092_v57, %v2913_v7  ;;  %3957 = vmatpush3.bf16.msra.mxu0 %v3956_v59 }
0x1361   : > { %3958 = vmatprep.subr.bf16.mxu0 %v4112_v46  ;;  %v2954_v36 = vmul.f32 %v2950_v18, %v2946_v15 }
0x1362   : > { %v2953_v30 = vmul.f32 %v2950_v18, %v2945_v14 }
0x1363   : > { %v2962_v31 = vadd.f32 %v2958_v8, %v2954_v36 }
0x1364   : > { %v2961_v22 = vadd.f32 %v2958_v8, %v2953_v30 }
0x1366   : > { %v3959_v39 = vpack.c.bf16 %v2962_v31, %v2961_v22 }
0x1368   : > { %3960 = vmatpush3.bf16.msra.mxu0 %v3959_v39 }
0x136b   : > { %3729 = vmatmul.mubr.msk.f32.vlgmr.msra.gmra.mrb[56].mxu0 %vm480_vm0, %v475_v48 }
0x143e   : > { %v3032_v38 = vpop.f32.mrb[56].mxu0 }
0x143f   : > { %v3036_v23 = vmul.f32 %v3032_v38, %v3032_v38  ;;  %v3730_v32 = vpop.f32.mrb[57].mxu0 }
0x1441   : > { %v3038_v3 = vsel %vm3037_vm3, %v3036_v23, 0.0 }
0x1442   : > { %3039 = vadd.xlane.f32.xlu0 %v3038_v3 }
0x14cf   : > { %v3040_v13 = vpop.xlane.xlu0 %3039 }
0x14d0   : > { %v3041_v35 = vmax.f32 %v3040_v13, 1e-24 }
0x14d2   : > { %4093 = vrsqrt.f32 %v3041_v35 }
0x14dc   : > { %v4094_v11 = vpop.eup %4093 }
0x14dd   : > { %v3043_v33 = vmul.f32 %v4094_v11, %v3032_v38 }
0x14df   : > { %v3044_v34 = vsel %vm480_vm0, %v3043_v33, 0.0 }
0x14e0   : > { %3045 = vst [vmem:[%s462_s22] sm:$0xf] %v3044_v34 }
0x14e1 PF: > { %s18_s27 = sadd.s32 1, %s4109_s27  }
0x14e2   : > { %p15_p6 = scmp.ge.s32.totalorder %s18_s27, 4  }
0x14e4   :  { %17 = sbr.rel (!%p15_p6) target bundleno = 1 (0x1), region = 107 }

</bundles_post_ra>
